<compile_context>
chip_gen: v5e
topology: v5e:2x2
jax: 0.10.0
libtpu: 0.0.40
codegen_flags: <defaults>
</compile_context>

<pallas_src>
import functools

import jax
import jax.numpy as jnp
import numpy as np
from jax import lax
from jax.experimental import pallas as pl
from jax.experimental.pallas import tpu as pltpu


# ---------------------------------------------------------------------------
# numeric helpers
# ---------------------------------------------------------------------------
def _sigmoid_eup(x):
    # sigmoid via tanh -> EUP slot (intentional ulp-level deviation)
    return 0.5 * jnp.tanh(0.5 * x) + 0.5


def _silu_eup(x):
    return x * _sigmoid_eup(x)


def _softplus(x):
    # matches torch.nn.functional.softplus (threshold = 20); keep fp32
    return jnp.where(x > 20.0, x, jnp.log1p(jnp.exp(x)))


def _round_up(v, m):
    return ((v + m - 1) // m) * m


def _layernorm(x, w, b, eps=1e-5):
    mu = jnp.mean(x, axis=-1, keepdims=True)
    var = jnp.mean(jnp.square(x - mu), axis=-1, keepdims=True)
    return (x - mu) * lax.rsqrt(var + eps) * w + b


N_SUB = 8  # sub-chunks packed across the 8 sublanes of a vreg in the scan


# ---------------------------------------------------------------------------
# Pallas kernel: one grid step == one (batch, L-tile)
# ---------------------------------------------------------------------------
def mamba_block_kernel(
    # inputs --------------------------------------------------------------
    x_ref,        # (1, Lt, H)   input tile (also the residual)
    cp_ref,       # (1, 1, I)    condition projection (hoisted to wrapper)
    hnx_ref,      # (1, 1, 1, I) pre-conv x_proj row at (l+1)*Lt (right halo)
    lnw_ref, lnb_ref,          # (1, H)   LayerNorm weight / bias
    win_ref, bin_ref,          # (H, 2I), (1, 2I)   input projection
    convw_ref, convb_ref,      # (3, I),  (1, I)    depthwise conv1d
    wdtbc_ref, bdtbc_ref,      # (I, P),  (1, P)    fused dt/B/C projection
    dtb_ref,                   # (1, Rp)  dt_bias (padded with -1e9)
    alog_ref,                  # (1, Np)  A_log    (padded with 0)
    dpar_ref,                  # (1, I)   D
    wout_ref, bout_ref,        # (I, H),  (1, H)    output projection
    # outputs -------------------------------------------------------------
    out_ref,                   # (1, Lt, H)
    # persistent scratch (carried across the L-tile grid axis) -------------
    state_ref,                 # (1, Np)  selective-scan state
    halo_ref,                  # (1, I)   last pre-conv x_proj row of prev tile
    *, rank, compute_dtype,
):
    Lt = x_ref.shape[1]
    I = dpar_ref.shape[1]
    r_pad = dtb_ref.shape[1]
    n_pad = alog_ref.shape[1]
    blk = Lt // N_SUB

    li = pl.program_id(1)

    # reset the carries at the start of every sequence
    @pl.when(li == 0)
    def _():
        state_ref[...] = jnp.zeros_like(state_ref)
        halo_ref[...] = jnp.zeros_like(halo_ref)

    x = x_ref[0]                                        # (Lt, H) residual
    xn = _layernorm(x, lnw_ref[...], lnb_ref[...])      # fp32

    # ---- input projection -> x_proj / gate -------------------------------
    proj = jnp.dot(xn.astype(compute_dtype), win_ref[...],
                   preferred_element_type=jnp.float32) + bin_ref[...]
    xp_raw = proj[:, :I]        # (Lt, I)   (I is a multiple of 128 in prod)
    gate = proj[:, I:]          # (Lt, I)

    # ---- depthwise conv1d (k=3, pad=1) with explicit cross-tile halos ----
    halo_prev = halo_ref[...]                           # row l*Lt - 1
    halo_next = hnx_ref[0, 0]                           # row (l+1)*Lt
    halo_ref[...] = xp_raw[Lt - 1:Lt, :]                # carry for next tile
    row = lax.broadcasted_iota(jnp.int32, (Lt, 1), 0)   # (Lt,1) mask index
    xp_prev = jnp.where(row == 0, halo_prev, pltpu.roll(xp_raw, 1, axis=0))
    xp_next = jnp.where(row == Lt - 1, halo_next,
                        pltpu.roll(xp_raw, Lt - 1, axis=0))  # roll(-1)==roll(Lt-1)
    cw = convw_ref[...]
    xp = (xp_prev * cw[0:1, :] + xp_raw * cw[1:2, :] + xp_next * cw[2:3, :]
          + convb_ref[...])

    # ---- SiLU + (hoisted) condition injection ----------------------------
    xp = _silu_eup(xp) + cp_ref[0]                      # (Lt, I)

    # ---- fused dt/B/C projection (single lane-dense matmul) --------------
    dtbc = jnp.dot(xp.astype(compute_dtype), wdtbc_ref[...],
                   preferred_element_type=jnp.float32) + bdtbc_ref[...]
    dt = dtbc[:, :r_pad]                   # 128-aligned slices
    Bm = dtbc[:, r_pad:r_pad + n_pad]
    Cm = dtbc[:, r_pad + n_pad:]

    A = -jnp.exp(alog_ref[...])                         # (1, Np)
    dt = _softplus(dt + dtb_ref[...])                   # fp32; padded cols -> 0
    dt_mean = jnp.sum(dt, axis=-1, keepdims=True) * (1.0 / rank)   # (Lt, 1)
    A_disc = jnp.exp(A * dt_mean)                       # (Lt, Np)
    x_mean = jnp.mean(xp, axis=-1, keepdims=True)       # (Lt, 1)
    Bu = (Bm * dt_mean) * x_mean                        # (Lt, Np)

    # ---- blocked selective scan: 8 sub-chunks across sublanes ------------
    a3 = A_disc.reshape(N_SUB, blk, n_pad)              # minor dim untouched
    b3 = Bu.reshape(N_SUB, blk, n_pad)

    # pass 1: per-sub-chunk summaries (zero-init partial state S, gain P);
    # all 8 recurrences advance in one (8, Np) vreg slab per step.
    h = jnp.zeros((N_SUB, n_pad), jnp.float32)
    cum = jnp.ones((N_SUB, n_pad), jnp.float32)
    for t in range(blk):                                # static unroll
        a_t = a3[:, t, :]
        h = a_t * h + b3[:, t, :]
        cum = cum * a_t
    s_blk, p_blk = h, cum                               # (8, Np)

    # short serial scan across sub-chunks, seeded by the carried tile state
    h_carry = state_ref[...]                            # (1, Np)
    inits = []
    for j in range(N_SUB):
        inits.append(h_carry)
        h_carry = p_blk[j:j + 1, :] * h_carry + s_blk[j:j + 1, :]
    state_ref[...] = h_carry                            # carry to next L tile
    h0 = jnp.concatenate(inits, axis=0)                 # (8, Np) block inits

    # pass 2: true states with correct sub-chunk inits; lane-dense output
    h = h0
    rows = []
    for t in range(blk):                                # static unroll
        h = a3[:, t, :] * h + b3[:, t, :]
        rows.append(h)
    h_all = jnp.stack(rows, axis=1).reshape(Lt, n_pad)  # original row order
    y = jnp.sum(Cm * h_all, axis=-1, keepdims=True)     # (Lt, 1), one reduction

    y = y + xp * dpar_ref[...]                          # D skip term

    # ---- gating, output projection, residual -----------------------------
    y = y * _silu_eup(gate)
    out = jnp.dot(y.astype(compute_dtype), wout_ref[...],
                  preferred_element_type=jnp.float32) + bout_ref[...]
    # dropout == identity (eval mode)
    out_ref[0] = x + out


# ---------------------------------------------------------------------------
# wrapper
# ---------------------------------------------------------------------------
def _pick_l_tile(L, requested):
    assert L % 8 == 0, "sequence length must be a multiple of 8"
    lt = max(8, min(int(requested), L))
    lt = (lt // 8) * 8
    while L % lt:
        lt -= 8
    return lt


def _default_vmem_limit():
    # re-derive per chip: ~3/4 of physical VMEM, capped at 100 MiB
    try:
        cap = int(pltpu.get_tpu_info().vmem_capacity_bytes)
        return min(cap * 3 // 4, 100 * 1024 * 1024)
    except Exception:
        return 32 * 1024 * 1024  # conservative fallback (interpret / unknown)


def mamba_block_forward(x, condition, params, *, matmul_dtype=jnp.bfloat16,
                        l_tile=256):
    B, L, H = x.shape
    I = int(params["D"].shape[0])
    N = int(params["A_log"].shape[0])
    R = int(params["dt_bias"].shape[0])
    assert params["w_dt"].shape == (I, R)
    # The PyTorch module adds dt_bias [intermediate_dim] to dt [B,L,dt_rank];
    # this only broadcasts when dt_rank == intermediate_dim.
    assert R == I, "dt_rank must equal intermediate_dim (dt_bias broadcast)"

    x = x.astype(jnp.float32)
    condition = condition.astype(jnp.float32)

    n_pad = _round_up(N, 128)
    r_pad = _round_up(R, 128)
    P = r_pad + 2 * n_pad

    # L tile: multiple of 8 (sublane-packed scan); prefer multiples of 256 on
    # v6e/v7x (pass l_tile=512 on v5e for more DMA amortization).
    lt = _pick_l_tile(L, l_tile)
    nt = L // lt

    mm = lambda w: w.astype(matmul_dtype)   # bf16 matmul operands by default

    # --- pad & fuse dt / B / C projection weights (exact padding) ---------
    w_dt = jnp.pad(params["w_dt"], ((0, 0), (0, r_pad - R)))
    b_dt = jnp.pad(params["b_dt"], (0, r_pad - R))
    # padded dt columns: 0 + 0 + (-1e9) -> fp32 softplus == 0 -> mean unaffected
    dt_bias = jnp.pad(params["dt_bias"], (0, r_pad - R), constant_values=-1e9)
    w_B = jnp.pad(params["w_B"], ((0, 0), (0, n_pad - N)))
    b_B = jnp.pad(params["b_B"], (0, n_pad - N))
    w_C = jnp.pad(params["w_C"], ((0, 0), (0, n_pad - N)))
    b_C = jnp.pad(params["b_C"], (0, n_pad - N))
    # padded A_log = 0 -> A = -1; padded B/C = 0 so padded state stays 0
    A_log = jnp.pad(params["A_log"], (0, n_pad - N))
    w_dtbc = jnp.concatenate([w_dt, w_B, w_C], axis=1)          # (I, P)
    b_dtbc = jnp.concatenate([b_dt, b_B, b_C], axis=0).reshape(1, P)

    # --- hoisted, L-independent wrapper compute ---------------------------
    # condition projection: one (B,H)x(H,I) matmul, frees w_cond from VMEM
    cp = (jnp.dot(condition.astype(matmul_dtype), mm(params["w_cond"]),
                  preferred_element_type=jnp.float32)
          + params["b_cond"]).reshape(B, 1, I)
    # conv right-halo rows: pre-conv x_proj at rows (l+1)*lt (tiny matmul);
    # last tile's halo is 0 (sequence zero-padding of the k=3 conv).
    if nt > 1:
        rows = x[:, jnp.arange(1, nt) * lt, :]                   # (B, nt-1, H)
        rows_n = _layernorm(rows, params["ln_w"], params["ln_b"])
        hnx = (jnp.dot(rows_n.astype(matmul_dtype), mm(params["w_in"][:, :I]),
                       preferred_element_type=jnp.float32)
               + params["b_in"][:I])
        hnx = jnp.concatenate([hnx, jnp.zeros((B, 1, I), jnp.float32)], axis=1)
    else:
        hnx = jnp.zeros((B, 1, I), jnp.float32)
    hnx = hnx.reshape(B, nt, 1, I)

    weight_arrays = [
        params["ln_w"].reshape(1, H),
        params["ln_b"].reshape(1, H),
        mm(params["w_in"]),                # (H, 2I)
        params["b_in"].reshape(1, 2 * I),
        params["conv_w"],                  # (3, I)
        params["conv_b"].reshape(1, I),
        mm(w_dtbc),                        # (I, P)
        b_dtbc,                            # (1, P)
        dt_bias.reshape(1, r_pad),
        A_log.reshape(1, n_pad),
        params["D"].reshape(1, I),
        mm(params["w_out"]),               # (I, H)
        params["b_out"].reshape(1, H),
    ]
    # Constant index map + single buffering: weights DMA'd once and kept
    # resident at half the default (double-buffered) footprint.
    weight_specs = [
        pl.BlockSpec(w.shape, lambda b, l: (0, 0), pipeline_mode=pl.Buffered(1))
        for w in weight_arrays
    ]

    grid_spec = pltpu.PrefetchScalarGridSpec(
        num_scalar_prefetch=0,
        grid=(B, nt),
        in_specs=[
            pl.BlockSpec((1, lt, H), lambda b, l: (b, l, 0)),       # x tile
            pl.BlockSpec((1, 1, I), lambda b, l: (b, 0, 0)),        # cond proj
            pl.BlockSpec((1, 1, 1, I), lambda b, l: (b, l, 0, 0)),  # right halo
        ] + weight_specs,
        out_specs=pl.BlockSpec((1, lt, H), lambda b, l: (b, l, 0)),
        scratch_shapes=[
            pltpu.VMEM((1, n_pad), jnp.float32),   # selective-scan state carry
            pltpu.VMEM((1, I), jnp.float32),       # conv left-halo carry
        ],
    )

    kernel = functools.partial(mamba_block_kernel, rank=R,
                               compute_dtype=matmul_dtype)

    return pl.pallas_call(
        kernel,
        out_shape=jax.ShapeDtypeStruct((B, L, H), jnp.float32),
        grid_spec=grid_spec,
        compiler_params=pltpu.CompilerParams(
            # batch axis -> megacore on v7x; L axis is a sequential carry.
            dimension_semantics=("parallel", "arbitrary"),
            vmem_limit_bytes=_default_vmem_limit(),
        ),
    )(x, cp, hnx, *weight_arrays)


# ---------------------------------------------------------------------------
# pure-JAX reference (mirrors the PyTorch forward exactly, eval mode)
# ---------------------------------------------------------------------------
def reference_forward(x, condition, p):
    B, L, H = x.shape
    I = p["D"].shape[0]
    N = p["A_log"].shape[0]
    residual = x

    mu = x.mean(-1, keepdims=True)
    var = ((x - mu) ** 2).mean(-1, keepdims=True)
    xn = (x - mu) / jnp.sqrt(var + 1e-5) * p["ln_w"] + p["ln_b"]

    proj = xn @ p["w_in"] + p["b_in"]
    xp, gate = proj[..., :I], proj[..., I:]

    xpad = jnp.pad(xp, ((0, 0), (1, 1), (0, 0)))
    xp = (xpad[:, :-2] * p["conv_w"][0] + xpad[:, 1:-1] * p["conv_w"][1]
          + xpad[:, 2:] * p["conv_w"][2]) + p["conv_b"]

    xp = xp * (1.0 / (1.0 + jnp.exp(-xp)))
    cp = condition @ p["w_cond"] + p["b_cond"]
    xp = xp + cp[:, None, :]

    dt = xp @ p["w_dt"] + p["b_dt"]
    Bm = xp @ p["w_B"] + p["b_B"]
    Cm = xp @ p["w_C"] + p["b_C"]
    A = -jnp.exp(p["A_log"])
    dt = _softplus(dt + p["dt_bias"])
    dtm = dt.mean(-1, keepdims=True)
    A_disc = jnp.exp(A[None, None, :] * dtm)
    Bu = (Bm * dtm) * xp.mean(-1, keepdims=True)

    h = jnp.zeros((B, N), jnp.float32)
    ys = []
    for i in range(L):
        h = A_disc[:, i] * h + Bu[:, i]
        ys.append(jnp.sum(Cm[:, i] * h, axis=-1))
    y = jnp.stack(ys, axis=1)[..., None]
    y = y + xp * p["D"]

    y = y * (gate * (1.0 / (1.0 + jnp.exp(-gate))))
    y = y @ p["w_out"] + p["b_out"]
    return residual + y


# ---------------------------------------------------------------------------
# deterministic parameter init + smoke test
# ---------------------------------------------------------------------------
def init_params(key, hidden_dim, state_dim, expand_factor):
    I = hidden_dim * expand_factor
    R = I          # dt_rank == intermediate_dim (required for dt_bias broadcast)
    N = state_dim
    ks = jax.random.split(key, 16)
    s = 0.05
    return {
        "ln_w": jnp.ones((hidden_dim,), jnp.float32),
        "ln_b": jnp.zeros((hidden_dim,), jnp.float32),
        "w_in": s * jax.random.normal(ks[0], (hidden_dim, 2 * I), jnp.float32),
        "b_in": s * jax.random.normal(ks[1], (2 * I,), jnp.float32),
        "conv_w": s * jax.random.normal(ks[2], (3, I), jnp.float32),
        "conv_b": s * jax.random.normal(ks[3], (I,), jnp.float32),
        "w_cond": s * jax.random.normal(ks[4], (hidden_dim, I), jnp.float32),
        "b_cond": s * jax.random.normal(ks[5], (I,), jnp.float32),
        "w_dt": s * jax.random.normal(ks[6], (I, R), jnp.float32),
        "b_dt": s * jax.random.normal(ks[7], (R,), jnp.float32),
        "dt_bias": jax.random.uniform(ks[8], (R,), jnp.float32),
        "A_log": jnp.log(jnp.arange(1, N + 1, dtype=jnp.float32)),
        "D": jnp.ones((I,), jnp.float32),
        "w_B": s * jax.random.normal(ks[9], (I, N), jnp.float32),
        "b_B": s * jax.random.normal(ks[10], (N,), jnp.float32),
        "w_C": s * jax.random.normal(ks[11], (I, N), jnp.float32),
        "b_C": s * jax.random.normal(ks[12], (N,), jnp.float32),
        "w_out": s * jax.random.normal(ks[13], (I, hidden_dim), jnp.float32),
        "b_out": s * jax.random.normal(ks[14], (hidden_dim,), jnp.float32),
    }


if __name__ == "__main__":
    key = jax.random.PRNGKey(0)
    B, L, hidden_dim = 2, 32, 16
    state_dim, expand_factor = 16, 2

    k_p, k_x, k_c = jax.random.split(key, 3)
    params = init_params(k_p, hidden_dim, state_dim, expand_factor)
    x = jax.random.normal(k_x, (B, L, hidden_dim), jnp.float32)
    condition = jax.random.normal(k_c, (B, hidden_dim), jnp.float32)

    ref = jax.block_until_ready(reference_forward(x, condition, params))

    # fp32 matmul operands, 2 L-tiles of 16 (exercises conv halos + state carry)
    # tolerance 2e-3: TPU default f32 matmul precision differs between the
    # XLA reference and the in-kernel MXU path.
    out_f32 = jax.block_until_ready(
        mamba_block_forward(x, condition, params,
                            matmul_dtype=jnp.float32, l_tile=16))
    np.testing.assert_allclose(np.asarray(out_f32), np.asarray(ref),
                               rtol=2e-3, atol=2e-3)

    # bf16 matmul operands (production default), 4 L-tiles of 8 (blk == 1 path)
    out_bf16 = jax.block_until_ready(
        mamba_block_forward(x, condition, params,
                            matmul_dtype=jnp.bfloat16, l_tile=8))
    np.testing.assert_allclose(np.asarray(out_bf16), np.asarray(ref),
                               rtol=6e-2, atol=6e-2)

    print("KERNEL_OK")
</pallas_src>

<mosaic_0001>
module attributes {stable_mosaic.version = 11 : i64} {
  func.func @mamba_block_kernel(%arg0: i32, %arg1: i32, %arg2: memref<1x16x16xf32, #tpu.memory_space<vmem>>, %arg3: memref<1x1x32xf32, #tpu.memory_space<vmem>>, %arg4: memref<1x1x1x32xf32, #tpu.memory_space<vmem>>, %arg5: memref<1x16xf32, #tpu.memory_space<vmem>>, %arg6: memref<1x16xf32, #tpu.memory_space<vmem>>, %arg7: memref<16x64xf32, #tpu.memory_space<vmem>>, %arg8: memref<1x64xf32, #tpu.memory_space<vmem>>, %arg9: memref<3x32xf32, #tpu.memory_space<vmem>>, %arg10: memref<1x32xf32, #tpu.memory_space<vmem>>, %arg11: memref<32x384xf32, #tpu.memory_space<vmem>>, %arg12: memref<1x384xf32, #tpu.memory_space<vmem>>, %arg13: memref<1x128xf32, #tpu.memory_space<vmem>>, %arg14: memref<1x128xf32, #tpu.memory_space<vmem>>, %arg15: memref<1x32xf32, #tpu.memory_space<vmem>>, %arg16: memref<32x16xf32, #tpu.memory_space<vmem>>, %arg17: memref<1x16xf32, #tpu.memory_space<vmem>>, %arg18: memref<1x16x16xf32, #tpu.memory_space<vmem>>, %arg19: memref<1x128xf32, #tpu.memory_space<vmem>>, %arg20: memref<1x32xf32, #tpu.memory_space<vmem>>) attributes {dimension_semantics = [#tpu.dimension_semantics<parallel>, #tpu.dimension_semantics<arbitrary>], iteration_bounds = array<i64: 2, 2>, scalar_prefetch = 0 : i64, scratch_operands = 2 : i64, tpu.core_type = #tpu.core_type<tc>, window_params = [{transform_indices = @transform_0, window_bounds = array<i64: 1, 16, 16>}, {transform_indices = @transform_1, window_bounds = array<i64: 1, 1, 32>}, {transform_indices = @transform_2, window_bounds = array<i64: 1, 1, 1, 32>}, {pipeline_mode = #tpu.pipeline_mode<synchronous>, transform_indices = @transform_3, window_bounds = array<i64: 1, 16>}, {pipeline_mode = #tpu.pipeline_mode<synchronous>, transform_indices = @transform_4, window_bounds = array<i64: 1, 16>}, {pipeline_mode = #tpu.pipeline_mode<synchronous>, transform_indices = @transform_5, window_bounds = array<i64: 16, 64>}, {pipeline_mode = #tpu.pipeline_mode<synchronous>, transform_indices = @transform_6, window_bounds = array<i64: 1, 64>}, {pipeline_mode = #tpu.pipeline_mode<synchronous>, transform_indices = @transform_7, window_bounds = array<i64: 3, 32>}, {pipeline_mode = #tpu.pipeline_mode<synchronous>, transform_indices = @transform_8, window_bounds = array<i64: 1, 32>}, {pipeline_mode = #tpu.pipeline_mode<synchronous>, transform_indices = @transform_9, window_bounds = array<i64: 32, 384>}, {pipeline_mode = #tpu.pipeline_mode<synchronous>, transform_indices = @transform_10, window_bounds = array<i64: 1, 384>}, {pipeline_mode = #tpu.pipeline_mode<synchronous>, transform_indices = @transform_11, window_bounds = array<i64: 1, 128>}, {pipeline_mode = #tpu.pipeline_mode<synchronous>, transform_indices = @transform_12, window_bounds = array<i64: 1, 128>}, {pipeline_mode = #tpu.pipeline_mode<synchronous>, transform_indices = @transform_13, window_bounds = array<i64: 1, 32>}, {pipeline_mode = #tpu.pipeline_mode<synchronous>, transform_indices = @transform_14, window_bounds = array<i64: 32, 16>}, {pipeline_mode = #tpu.pipeline_mode<synchronous>, transform_indices = @transform_15, window_bounds = array<i64: 1, 16>}, {transform_indices = @transform_16, window_bounds = array<i64: 1, 16, 16>}]} {
    %c0_i32 = arith.constant 0 : i32
    %0 = arith.cmpi eq, %arg1, %c0_i32 : i32
    %1 = arith.extui %0 : i1 to i32
    %c0_i32_0 = arith.constant 0 : i32
    %2 = arith.cmpi ne, %1, %c0_i32_0 : i32
    scf.if %2 {
      %cst_71 = arith.constant 0.000000e+00 : f32
      %216 = vector.broadcast %cst_71 : f32 to vector<1x128xf32>
      %c0_72 = arith.constant 0 : index
      %c0_73 = arith.constant 0 : index
      %217 = vector.load %arg19[%c0_72, %c0_73] : memref<1x128xf32, #tpu.memory_space<vmem>>, vector<1x128xf32>
      tpu.vector_store %arg19[%c0_72, %c0_73], %216 {strides = array<i32>} : memref<1x128xf32, #tpu.memory_space<vmem>>, vector<1x128xf32>,
      %cst_74 = arith.constant 0.000000e+00 : f32
      %218 = vector.broadcast %cst_74 : f32 to vector<1x32xf32>
      %c0_75 = arith.constant 0 : index
      %c0_76 = arith.constant 0 : index
      %219 = vector.load %arg20[%c0_75, %c0_76] : memref<1x32xf32, #tpu.memory_space<vmem>>, vector<1x32xf32>
      tpu.vector_store %arg20[%c0_75, %c0_76], %218 {strides = array<i32>} : memref<1x32xf32, #tpu.memory_space<vmem>>, vector<1x32xf32>,
    } else {
    }
    %c0 = arith.constant 0 : index
    %c0_1 = arith.constant 0 : index
    %c0_2 = arith.constant 0 : index
    %3 = vector.load %arg2[%c0, %c0_1, %c0_2] : memref<1x16x16xf32, #tpu.memory_space<vmem>>, vector<1x16x16xf32>
    %4 = vector.shape_cast %3 : vector<1x16x16xf32> to vector<16x16xf32>
    %c0_3 = arith.constant 0 : index
    %c0_4 = arith.constant 0 : index
    %5 = vector.load %arg5[%c0_3, %c0_4] : memref<1x16xf32, #tpu.memory_space<vmem>>, vector<1x16xf32>
    %c0_5 = arith.constant 0 : index
    %c0_6 = arith.constant 0 : index
    %6 = vector.load %arg6[%c0_5, %c0_6] : memref<1x16xf32, #tpu.memory_space<vmem>>, vector<1x16xf32>
    %cst = arith.constant dense<0.000000e+00> : vector<16xf32>
    %7 = vector.multi_reduction <add>, %4, %cst [1] : vector<16x16xf32> to vector<16xf32>
    %8 = vector.shape_cast %7 : vector<16xf32> to vector<16x1xf32>
    %cst_7 = arith.constant 1.600000e+01 : f32
    %9 = vector.broadcast %cst_7 : f32 to vector<16x1xf32>
    %10 = arith.divf %8, %9 : vector<16x1xf32>
    %11 = vector.broadcast %10 : vector<16x1xf32> to vector<16x16xf32>
    %12 = arith.subf %4, %11 : vector<16x16xf32>
    %13 = arith.mulf %12, %12 : vector<16x16xf32>
    %cst_8 = arith.constant dense<0.000000e+00> : vector<16xf32>
    %14 = vector.multi_reduction <add>, %13, %cst_8 [1] : vector<16x16xf32> to vector<16xf32>
    %15 = vector.shape_cast %14 : vector<16xf32> to vector<16x1xf32>
    %cst_9 = arith.constant 1.600000e+01 : f32
    %16 = vector.broadcast %cst_9 : f32 to vector<16x1xf32>
    %17 = arith.divf %15, %16 : vector<16x1xf32>
    %18 = vector.broadcast %10 : vector<16x1xf32> to vector<16x16xf32>
    %19 = arith.subf %4, %18 : vector<16x16xf32>
    %cst_10 = arith.constant 9.99999974E-6 : f32
    %20 = vector.broadcast %cst_10 : f32 to vector<16x1xf32>
    %21 = arith.addf %17, %20 : vector<16x1xf32>
    %22 = math.rsqrt %21 : vector<16x1xf32>
    %23 = vector.broadcast %22 : vector<16x1xf32> to vector<16x16xf32>
    %24 = arith.mulf %19, %23 : vector<16x16xf32>
    %25 = vector.broadcast %5 : vector<1x16xf32> to vector<16x16xf32>
    %26 = arith.mulf %24, %25 : vector<16x16xf32>
    %27 = vector.broadcast %6 : vector<1x16xf32> to vector<16x16xf32>
    %28 = arith.addf %26, %27 : vector<16x16xf32>
    %c0_11 = arith.constant 0 : index
    %c0_12 = arith.constant 0 : index
    %29 = vector.load %arg7[%c0_11, %c0_12] : memref<16x64xf32, #tpu.memory_space<vmem>>, vector<16x64xf32>
    %cst_13 = arith.constant dense<0.000000e+00> : vector<16x64xf32>
    %30 = tpu.matmul %28, %29, %cst_13 {dimension_numbers = #tpu.dot_dimension_numbers<[1], [0], [0], [1], [0, 0, 1, 1], [], []>} : vector<16x16xf32>, vector<16x64xf32>, vector<16x64xf32> -> vector<16x64xf32>
    %c0_14 = arith.constant 0 : index
    %c0_15 = arith.constant 0 : index
    %31 = vector.load %arg8[%c0_14, %c0_15] : memref<1x64xf32, #tpu.memory_space<vmem>>, vector<1x64xf32>
    %32 = vector.broadcast %31 : vector<1x64xf32> to vector<16x64xf32>
    %33 = arith.addf %30, %32 : vector<16x64xf32>
    %34 = vector.extract_strided_slice %33 {offsets = [0, 0], sizes = [16, 32], strides = [1, 1]} : vector<16x64xf32> to vector<16x32xf32>
    %35 = vector.extract_strided_slice %33 {offsets = [0, 32], sizes = [16, 32], strides = [1, 1]} : vector<16x64xf32> to vector<16x32xf32>
    %c0_16 = arith.constant 0 : index
    %c0_17 = arith.constant 0 : index
    %36 = vector.load %arg20[%c0_16, %c0_17] : memref<1x32xf32, #tpu.memory_space<vmem>>, vector<1x32xf32>
    %c0_18 = arith.constant 0 : index
    %c0_19 = arith.constant 0 : index
    %c0_20 = arith.constant 0 : index
    %c0_21 = arith.constant 0 : index
    %37 = vector.load %arg4[%c0_18, %c0_19, %c0_20, %c0_21] : memref<1x1x1x32xf32, #tpu.memory_space<vmem>>, vector<1x1x1x32xf32>
    %38 = vector.shape_cast %37 : vector<1x1x1x32xf32> to vector<1x32xf32>
    %39 = vector.extract_strided_slice %34 {offsets = [15, 0], sizes = [1, 32], strides = [1, 1]} : vector<16x32xf32> to vector<1x32xf32>
    %c0_22 = arith.constant 0 : index
    %c0_23 = arith.constant 0 : index
    %40 = vector.load %arg20[%c0_22, %c0_23] : memref<1x32xf32, #tpu.memory_space<vmem>>, vector<1x32xf32>
    tpu.vector_store %arg20[%c0_22, %c0_23], %39 {strides = array<i32>} : memref<1x32xf32, #tpu.memory_space<vmem>>, vector<1x32xf32>,
    %41 = tpu.iota {dimensions = array<i32: 0>} : vector<16x1xi32>
    %c0_i32_24 = arith.constant 0 : i32
    %42 = vector.broadcast %c0_i32_24 : i32 to vector<16x1xi32>
    %43 = arith.cmpi eq, %41, %42 : vector<16x1xi32>
    %c1_i32 = arith.constant 1 : i32
    %44 = tpu.dynamic_rotate %34 by %c1_i32 dim 0 : vector<16x32xf32>, i32 -> vector<16x32xf32>
    %45 = vector.shape_cast %43 : vector<16x1xi1> to vector<16x1xi1>
    %46 = vector.broadcast %45 : vector<16x1xi1> to vector<16x32xi1>
    %47 = vector.shape_cast %36 : vector<1x32xf32> to vector<1x32xf32>
    %48 = vector.broadcast %47 : vector<1x32xf32> to vector<16x32xf32>
    %49 = arith.select %46, %48, %44 : vector<16x32xi1>, vector<16x32xf32>
    %c15_i32 = arith.constant 15 : i32
    %50 = vector.broadcast %c15_i32 : i32 to vector<16x1xi32>
    %51 = arith.cmpi eq, %41, %50 : vector<16x1xi32>
    %c15_i32_25 = arith.constant 15 : i32
    %52 = tpu.dynamic_rotate %34 by %c15_i32_25 dim 0 : vector<16x32xf32>, i32 -> vector<16x32xf32>
    %53 = vector.shape_cast %51 : vector<16x1xi1> to vector<16x1xi1>
    %54 = vector.broadcast %53 : vector<16x1xi1> to vector<16x32xi1>
    %55 = vector.shape_cast %38 : vector<1x32xf32> to vector<1x32xf32>
    %56 = vector.broadcast %55 : vector<1x32xf32> to vector<16x32xf32>
    %57 = arith.select %54, %56, %52 : vector<16x32xi1>, vector<16x32xf32>
    %c0_26 = arith.constant 0 : index
    %c0_27 = arith.constant 0 : index
    %58 = vector.load %arg9[%c0_26, %c0_27] : memref<3x32xf32, #tpu.memory_space<vmem>>, vector<3x32xf32>
    %59 = vector.extract_strided_slice %58 {offsets = [0, 0], sizes = [1, 32], strides = [1, 1]} : vector<3x32xf32> to vector<1x32xf32>
    %60 = vector.broadcast %59 : vector<1x32xf32> to vector<16x32xf32>
    %61 = arith.mulf %49, %60 : vector<16x32xf32>
    %62 = vector.extract_strided_slice %58 {offsets = [1, 0], sizes = [1, 32], strides = [1, 1]} : vector<3x32xf32> to vector<1x32xf32>
    %63 = vector.broadcast %62 : vector<1x32xf32> to vector<16x32xf32>
    %64 = arith.mulf %34, %63 : vector<16x32xf32>
    %65 = arith.addf %61, %64 : vector<16x32xf32>
    %66 = vector.extract_strided_slice %58 {offsets = [2, 0], sizes = [1, 32], strides = [1, 1]} : vector<3x32xf32> to vector<1x32xf32>
    %67 = vector.broadcast %66 : vector<1x32xf32> to vector<16x32xf32>
    %68 = arith.mulf %57, %67 : vector<16x32xf32>
    %69 = arith.addf %65, %68 : vector<16x32xf32>
    %c0_28 = arith.constant 0 : index
    %c0_29 = arith.constant 0 : index
    %70 = vector.load %arg10[%c0_28, %c0_29] : memref<1x32xf32, #tpu.memory_space<vmem>>, vector<1x32xf32>
    %71 = vector.broadcast %70 : vector<1x32xf32> to vector<16x32xf32>
    %72 = arith.addf %69, %71 : vector<16x32xf32>
    %cst_30 = arith.constant 5.000000e-01 : f32
    %73 = vector.broadcast %cst_30 : f32 to vector<16x32xf32>
    %74 = arith.mulf %73, %72 : vector<16x32xf32>
    %75 = math.tanh %74 : vector<16x32xf32>
    %cst_31 = arith.constant 5.000000e-01 : f32
    %76 = vector.broadcast %cst_31 : f32 to vector<16x32xf32>
    %77 = arith.mulf %76, %75 : vector<16x32xf32>
    %cst_32 = arith.constant 5.000000e-01 : f32
    %78 = vector.broadcast %cst_32 : f32 to vector<16x32xf32>
    %79 = arith.addf %77, %78 : vector<16x32xf32>
    %80 = arith.mulf %72, %79 : vector<16x32xf32>
    %c0_33 = arith.constant 0 : index
    %c0_34 = arith.constant 0 : index
    %c0_35 = arith.constant 0 : index
    %81 = vector.load %arg3[%c0_33, %c0_34, %c0_35] : memref<1x1x32xf32, #tpu.memory_space<vmem>>, vector<1x1x32xf32>
    %82 = vector.shape_cast %81 : vector<1x1x32xf32> to vector<1x32xf32>
    %83 = vector.broadcast %82 : vector<1x32xf32> to vector<16x32xf32>
    %84 = arith.addf %80, %83 : vector<16x32xf32>
    %c0_36 = arith.constant 0 : index
    %c0_37 = arith.constant 0 : index
    %85 = vector.load %arg11[%c0_36, %c0_37] : memref<32x384xf32, #tpu.memory_space<vmem>>, vector<32x384xf32>
    %cst_38 = arith.constant dense<0.000000e+00> : vector<16x384xf32>
    %86 = tpu.matmul %84, %85, %cst_38 {dimension_numbers = #tpu.dot_dimension_numbers<[1], [0], [0], [1], [0, 0, 1, 1], [], []>} : vector<16x32xf32>, vector<32x384xf32>, vector<16x384xf32> -> vector<16x384xf32>
    %c0_39 = arith.constant 0 : index
    %c0_40 = arith.constant 0 : index
    %87 = vector.load %arg12[%c0_39, %c0_40] : memref<1x384xf32, #tpu.memory_space<vmem>>, vector<1x384xf32>
    %88 = vector.broadcast %87 : vector<1x384xf32> to vector<16x384xf32>
    %89 = arith.addf %86, %88 : vector<16x384xf32>
    %90 = vector.extract_strided_slice %89 {offsets = [0, 0], sizes = [16, 128], strides = [1, 1]} : vector<16x384xf32> to vector<16x128xf32>
    %91 = vector.extract_strided_slice %89 {offsets = [0, 128], sizes = [16, 128], strides = [1, 1]} : vector<16x384xf32> to vector<16x128xf32>
    %92 = vector.extract_strided_slice %89 {offsets = [0, 256], sizes = [16, 128], strides = [1, 1]} : vector<16x384xf32> to vector<16x128xf32>
    %c0_41 = arith.constant 0 : index
    %c0_42 = arith.constant 0 : index
    %93 = vector.load %arg14[%c0_41, %c0_42] : memref<1x128xf32, #tpu.memory_space<vmem>>, vector<1x128xf32>
    %94 = math.exp %93 : vector<1x128xf32>
    %cst_43 = arith.constant 0.000000e+00 : f32
    %95 = vector.broadcast %cst_43 : f32 to vector<1x128xf32>
    %96 = arith.subf %95, %94 : vector<1x128xf32>
    %c0_44 = arith.constant 0 : index
    %c0_45 = arith.constant 0 : index
    %97 = vector.load %arg13[%c0_44, %c0_45] : memref<1x128xf32, #tpu.memory_space<vmem>>, vector<1x128xf32>
    %98 = vector.broadcast %97 : vector<1x128xf32> to vector<16x128xf32>
    %99 = arith.addf %90, %98 : vector<16x128xf32>
    %cst_46 = arith.constant 2.000000e+01 : f32
    %100 = vector.broadcast %cst_46 : f32 to vector<16x128xf32>
    %101 = arith.cmpf ogt, %99, %100 : vector<16x128xf32>
    %102 = math.exp %99 : vector<16x128xf32>
    %103 = math.log1p %102 : vector<16x128xf32>
    %104 = arith.select %101, %99, %103 : vector<16x128xi1>, vector<16x128xf32>
    %cst_47 = arith.constant dense<0.000000e+00> : vector<16xf32>
    %105 = vector.multi_reduction <add>, %104, %cst_47 [1] : vector<16x128xf32> to vector<16xf32>
    %106 = vector.shape_cast %105 : vector<16xf32> to vector<16x1xf32>
    %cst_48 = arith.constant 3.125000e-02 : f32
    %107 = vector.broadcast %cst_48 : f32 to vector<16x1xf32>
    %108 = arith.mulf %106, %107 : vector<16x1xf32>
    %109 = vector.broadcast %96 : vector<1x128xf32> to vector<16x128xf32>
    %110 = vector.broadcast %108 : vector<16x1xf32> to vector<16x128xf32>
    %111 = arith.mulf %109, %110 : vector<16x128xf32>
    %112 = math.exp %111 : vector<16x128xf32>
    %cst_49 = arith.constant dense<0.000000e+00> : vector<16xf32>
    %113 = vector.multi_reduction <add>, %84, %cst_49 [1] : vector<16x32xf32> to vector<16xf32>
    %114 = vector.shape_cast %113 : vector<16xf32> to vector<16x1xf32>
    %cst_50 = arith.constant 3.200000e+01 : f32
    %115 = vector.broadcast %cst_50 : f32 to vector<16x1xf32>
    %116 = arith.divf %114, %115 : vector<16x1xf32>
    %117 = vector.broadcast %108 : vector<16x1xf32> to vector<16x128xf32>
    %118 = arith.mulf %91, %117 : vector<16x128xf32>
    %119 = vector.broadcast %116 : vector<16x1xf32> to vector<16x128xf32>
    %120 = arith.mulf %118, %119 : vector<16x128xf32>
    %121 = vector.shape_cast %112 : vector<16x128xf32> to vector<8x2x128xf32>
    %122 = vector.shape_cast %120 : vector<16x128xf32> to vector<8x2x128xf32>
    %cst_51 = arith.constant 0.000000e+00 : f32
    %123 = vector.broadcast %cst_51 : f32 to vector<8x128xf32>
    %cst_52 = arith.constant 1.000000e+00 : f32
    %124 = vector.broadcast %cst_52 : f32 to vector<8x128xf32>
    %125 = vector.extract_strided_slice %121 {offsets = [0, 0, 0], sizes = [8, 1, 128], strides = [1, 1, 1]} : vector<8x2x128xf32> to vector<8x1x128xf32>
    %126 = vector.shape_cast %125 : vector<8x1x128xf32> to vector<8x128xf32>
    %127 = arith.mulf %126, %123 : vector<8x128xf32>
    %128 = vector.extract_strided_slice %122 {offsets = [0, 0, 0], sizes = [8, 1, 128], strides = [1, 1, 1]} : vector<8x2x128xf32> to vector<8x1x128xf32>
    %129 = vector.shape_cast %128 : vector<8x1x128xf32> to vector<8x128xf32>
    %130 = arith.addf %127, %129 : vector<8x128xf32>
    %131 = arith.mulf %124, %126 : vector<8x128xf32>
    %132 = vector.extract_strided_slice %121 {offsets = [0, 1, 0], sizes = [8, 1, 128], strides = [1, 1, 1]} : vector<8x2x128xf32> to vector<8x1x128xf32>
    %133 = vector.shape_cast %132 : vector<8x1x128xf32> to vector<8x128xf32>
    %134 = arith.mulf %133, %130 : vector<8x128xf32>
    %135 = vector.extract_strided_slice %122 {offsets = [0, 1, 0], sizes = [8, 1, 128], strides = [1, 1, 1]} : vector<8x2x128xf32> to vector<8x1x128xf32>
    %136 = vector.shape_cast %135 : vector<8x1x128xf32> to vector<8x128xf32>
    %137 = arith.addf %134, %136 : vector<8x128xf32>
    %138 = arith.mulf %131, %133 : vector<8x128xf32>
    %c0_53 = arith.constant 0 : index
    %c0_54 = arith.constant 0 : index
    %139 = vector.load %arg19[%c0_53, %c0_54] : memref<1x128xf32, #tpu.memory_space<vmem>>, vector<1x128xf32>
    %140 = vector.extract_strided_slice %138 {offsets = [0, 0], sizes = [1, 128], strides = [1, 1]} : vector<8x128xf32> to vector<1x128xf32>
    %141 = arith.mulf %140, %139 : vector<1x128xf32>
    %142 = vector.extract_strided_slice %137 {offsets = [0, 0], sizes = [1, 128], strides = [1, 1]} : vector<8x128xf32> to vector<1x128xf32>
    %143 = arith.addf %141, %142 : vector<1x128xf32>
    %144 = vector.extract_strided_slice %138 {offsets = [1, 0], sizes = [1, 128], strides = [1, 1]} : vector<8x128xf32> to vector<1x128xf32>
    %145 = arith.mulf %144, %143 : vector<1x128xf32>
    %146 = vector.extract_strided_slice %137 {offsets = [1, 0], sizes = [1, 128], strides = [1, 1]} : vector<8x128xf32> to vector<1x128xf32>
    %147 = arith.addf %145, %146 : vector<1x128xf32>
    %148 = vector.extract_strided_slice %138 {offsets = [2, 0], sizes = [1, 128], strides = [1, 1]} : vector<8x128xf32> to vector<1x128xf32>
    %149 = arith.mulf %148, %147 : vector<1x128xf32>
    %150 = vector.extract_strided_slice %137 {offsets = [2, 0], sizes = [1, 128], strides = [1, 1]} : vector<8x128xf32> to vector<1x128xf32>
    %151 = arith.addf %149, %150 : vector<1x128xf32>
    %152 = vector.extract_strided_slice %138 {offsets = [3, 0], sizes = [1, 128], strides = [1, 1]} : vector<8x128xf32> to vector<1x128xf32>
    %153 = arith.mulf %152, %151 : vector<1x128xf32>
    %154 = vector.extract_strided_slice %137 {offsets = [3, 0], sizes = [1, 128], strides = [1, 1]} : vector<8x128xf32> to vector<1x128xf32>
    %155 = arith.addf %153, %154 : vector<1x128xf32>
    %156 = vector.extract_strided_slice %138 {offsets = [4, 0], sizes = [1, 128], strides = [1, 1]} : vector<8x128xf32> to vector<1x128xf32>
    %157 = arith.mulf %156, %155 : vector<1x128xf32>
    %158 = vector.extract_strided_slice %137 {offsets = [4, 0], sizes = [1, 128], strides = [1, 1]} : vector<8x128xf32> to vector<1x128xf32>
    %159 = arith.addf %157, %158 : vector<1x128xf32>
    %160 = vector.extract_strided_slice %138 {offsets = [5, 0], sizes = [1, 128], strides = [1, 1]} : vector<8x128xf32> to vector<1x128xf32>
    %161 = arith.mulf %160, %159 : vector<1x128xf32>
    %162 = vector.extract_strided_slice %137 {offsets = [5, 0], sizes = [1, 128], strides = [1, 1]} : vector<8x128xf32> to vector<1x128xf32>
    %163 = arith.addf %161, %162 : vector<1x128xf32>
    %164 = vector.extract_strided_slice %138 {offsets = [6, 0], sizes = [1, 128], strides = [1, 1]} : vector<8x128xf32> to vector<1x128xf32>
    %165 = arith.mulf %164, %163 : vector<1x128xf32>
    %166 = vector.extract_strided_slice %137 {offsets = [6, 0], sizes = [1, 128], strides = [1, 1]} : vector<8x128xf32> to vector<1x128xf32>
    %167 = arith.addf %165, %166 : vector<1x128xf32>
    %168 = vector.extract_strided_slice %138 {offsets = [7, 0], sizes = [1, 128], strides = [1, 1]} : vector<8x128xf32> to vector<1x128xf32>
    %169 = arith.mulf %168, %167 : vector<1x128xf32>
    %170 = vector.extract_strided_slice %137 {offsets = [7, 0], sizes = [1, 128], strides = [1, 1]} : vector<8x128xf32> to vector<1x128xf32>
    %171 = arith.addf %169, %170 : vector<1x128xf32>
    %c0_55 = arith.constant 0 : index
    %c0_56 = arith.constant 0 : index
    %172 = vector.load %arg19[%c0_55, %c0_56] : memref<1x128xf32, #tpu.memory_space<vmem>>, vector<1x128xf32>
    tpu.vector_store %arg19[%c0_55, %c0_56], %171 {strides = array<i32>} : memref<1x128xf32, #tpu.memory_space<vmem>>, vector<1x128xf32>,
    %173 = tpu.concatenate %139, %143, %147, %151, %155, %159, %163, %167 in 0 : vector<1x128xf32>, vector<1x128xf32>, vector<1x128xf32>, vector<1x128xf32>, vector<1x128xf32>, vector<1x128xf32>, vector<1x128xf32>, vector<1x128xf32> -> vector<8x128xf32>
    %174 = vector.extract_strided_slice %121 {offsets = [0, 0, 0], sizes = [8, 1, 128], strides = [1, 1, 1]} : vector<8x2x128xf32> to vector<8x1x128xf32>
    %175 = vector.shape_cast %174 : vector<8x1x128xf32> to vector<8x128xf32>
    %176 = arith.mulf %175, %173 : vector<8x128xf32>
    %177 = vector.extract_strided_slice %122 {offsets = [0, 0, 0], sizes = [8, 1, 128], strides = [1, 1, 1]} : vector<8x2x128xf32> to vector<8x1x128xf32>
    %178 = vector.shape_cast %177 : vector<8x1x128xf32> to vector<8x128xf32>
    %179 = arith.addf %176, %178 : vector<8x128xf32>
    %180 = vector.extract_strided_slice %121 {offsets = [0, 1, 0], sizes = [8, 1, 128], strides = [1, 1, 1]} : vector<8x2x128xf32> to vector<8x1x128xf32>
    %181 = vector.shape_cast %180 : vector<8x1x128xf32> to vector<8x128xf32>
    %182 = arith.mulf %181, %179 : vector<8x128xf32>
    %183 = vector.extract_strided_slice %122 {offsets = [0, 1, 0], sizes = [8, 1, 128], strides = [1, 1, 1]} : vector<8x2x128xf32> to vector<8x1x128xf32>
    %184 = vector.shape_cast %183 : vector<8x1x128xf32> to vector<8x128xf32>
    %185 = arith.addf %182, %184 : vector<8x128xf32>
    %186 = vector.shape_cast %179 : vector<8x128xf32> to vector<8x1x128xf32>
    %187 = vector.shape_cast %185 : vector<8x128xf32> to vector<8x1x128xf32>
    %188 = tpu.concatenate %186, %187 in 1 : vector<8x1x128xf32>, vector<8x1x128xf32> -> vector<8x2x128xf32>
    %189 = vector.shape_cast %188 : vector<8x2x128xf32> to vector<16x128xf32>
    %190 = arith.mulf %92, %189 : vector<16x128xf32>
    %cst_57 = arith.constant dense<0.000000e+00> : vector<16xf32>
    %191 = vector.multi_reduction <add>, %190, %cst_57 [1] : vector<16x128xf32> to vector<16xf32>
    %192 = vector.shape_cast %191 : vector<16xf32> to vector<16x1xf32>
    %c0_58 = arith.constant 0 : index
    %c0_59 = arith.constant 0 : index
    %193 = vector.load %arg15[%c0_58, %c0_59] : memref<1x32xf32, #tpu.memory_space<vmem>>, vector<1x32xf32>
    %194 = vector.broadcast %193 : vector<1x32xf32> to vector<16x32xf32>
    %195 = arith.mulf %84, %194 : vector<16x32xf32>
    %196 = vector.broadcast %192 : vector<16x1xf32> to vector<16x32xf32>
    %197 = arith.addf %196, %195 : vector<16x32xf32>
    %cst_60 = arith.constant 5.000000e-01 : f32
    %198 = vector.broadcast %cst_60 : f32 to vector<16x32xf32>
    %199 = arith.mulf %198, %35 : vector<16x32xf32>
    %200 = math.tanh %199 : vector<16x32xf32>
    %cst_61 = arith.constant 5.000000e-01 : f32
    %201 = vector.broadcast %cst_61 : f32 to vector<16x32xf32>
    %202 = arith.mulf %201, %200 : vector<16x32xf32>
    %cst_62 = arith.constant 5.000000e-01 : f32
    %203 = vector.broadcast %cst_62 : f32 to vector<16x32xf32>
    %204 = arith.addf %202, %203 : vector<16x32xf32>
    %205 = arith.mulf %35, %204 : vector<16x32xf32>
    %206 = arith.mulf %197, %205 : vector<16x32xf32>
    %c0_63 = arith.constant 0 : index
    %c0_64 = arith.constant 0 : index
    %207 = vector.load %arg16[%c0_63, %c0_64] : memref<32x16xf32, #tpu.memory_space<vmem>>, vector<32x16xf32>
    %cst_65 = arith.constant dense<0.000000e+00> : vector<16x16xf32>
    %208 = tpu.matmul %206, %207, %cst_65 {dimension_numbers = #tpu.dot_dimension_numbers<[1], [0], [0], [1], [0, 0, 1, 1], [], []>} : vector<16x32xf32>, vector<32x16xf32>, vector<16x16xf32> -> vector<16x16xf32>
    %c0_66 = arith.constant 0 : index
    %c0_67 = arith.constant 0 : index
    %209 = vector.load %arg17[%c0_66, %c0_67] : memref<1x16xf32, #tpu.memory_space<vmem>>, vector<1x16xf32>
    %210 = vector.broadcast %209 : vector<1x16xf32> to vector<16x16xf32>
    %211 = arith.addf %208, %210 : vector<16x16xf32>
    %212 = arith.addf %4, %211 : vector<16x16xf32>
    %c0_68 = arith.constant 0 : index
    %c0_69 = arith.constant 0 : index
    %c0_70 = arith.constant 0 : index
    %213 = vector.load %arg18[%c0_68, %c0_69, %c0_70] : memref<1x16x16xf32, #tpu.memory_space<vmem>>, vector<1x16x16xf32>
    %214 = vector.shape_cast %213 : vector<1x16x16xf32> to vector<16x16xf32>
    %215 = vector.shape_cast %212 : vector<16x16xf32> to vector<1x16x16xf32>
    tpu.vector_store %arg18[%c0_68, %c0_69, %c0_70], %215 {strides = array<i32>} : memref<1x16x16xf32, #tpu.memory_space<vmem>>, vector<1x16x16xf32>,
    return
  }
  func.func @transform_0(%arg0: i32, %arg1: i32) -> (i32, i32, i32) {
    %c0_i32 = arith.constant 0 : i32
    %c0_i32_0 = arith.constant 0 : i32
    return %arg0, %arg1, %c0_i32 : i32, i32, i32
  }
  func.func @transform_1(%arg0: i32, %arg1: i32) -> (i32, i32, i32) {
    %c0_i32 = arith.constant 0 : i32
    %c0_i32_0 = arith.constant 0 : i32
    %c0_i32_1 = arith.constant 0 : i32
    return %arg0, %c0_i32, %c0_i32_0 : i32, i32, i32
  }
  func.func @transform_2(%arg0: i32, %arg1: i32) -> (i32, i32, i32, i32) {
    %c0_i32 = arith.constant 0 : i32
    %c0_i32_0 = arith.constant 0 : i32
    %c0_i32_1 = arith.constant 0 : i32
    return %arg0, %arg1, %c0_i32, %c0_i32_0 : i32, i32, i32, i32
  }
  func.func @transform_3(%arg0: i32, %arg1: i32) -> (i32, i32) {
    %c0_i32 = arith.constant 0 : i32
    %c0_i32_0 = arith.constant 0 : i32
    %c0_i32_1 = arith.constant 0 : i32
    return %c0_i32, %c0_i32_0 : i32, i32
  }
  func.func @transform_4(%arg0: i32, %arg1: i32) -> (i32, i32) {
    %c0_i32 = arith.constant 0 : i32
    %c0_i32_0 = arith.constant 0 : i32
    %c0_i32_1 = arith.constant 0 : i32
    return %c0_i32, %c0_i32_0 : i32, i32
  }
  func.func @transform_5(%arg0: i32, %arg1: i32) -> (i32, i32) {
    %c0_i32 = arith.constant 0 : i32
    %c0_i32_0 = arith.constant 0 : i32
    %c0_i32_1 = arith.constant 0 : i32
    return %c0_i32, %c0_i32_0 : i32, i32
  }
  func.func @transform_6(%arg0: i32, %arg1: i32) -> (i32, i32) {
    %c0_i32 = arith.constant 0 : i32
    %c0_i32_0 = arith.constant 0 : i32
    %c0_i32_1 = arith.constant 0 : i32
    return %c0_i32, %c0_i32_0 : i32, i32
  }
  func.func @transform_7(%arg0: i32, %arg1: i32) -> (i32, i32) {
    %c0_i32 = arith.constant 0 : i32
    %c0_i32_0 = arith.constant 0 : i32
    %c0_i32_1 = arith.constant 0 : i32
    return %c0_i32, %c0_i32_0 : i32, i32
  }
  func.func @transform_8(%arg0: i32, %arg1: i32) -> (i32, i32) {
    %c0_i32 = arith.constant 0 : i32
    %c0_i32_0 = arith.constant 0 : i32
    %c0_i32_1 = arith.constant 0 : i32
    return %c0_i32, %c0_i32_0 : i32, i32
  }
  func.func @transform_9(%arg0: i32, %arg1: i32) -> (i32, i32) {
    %c0_i32 = arith.constant 0 : i32
    %c0_i32_0 = arith.constant 0 : i32
    %c0_i32_1 = arith.constant 0 : i32
    return %c0_i32, %c0_i32_0 : i32, i32
  }
  func.func @transform_10(%arg0: i32, %arg1: i32) -> (i32, i32) {
    %c0_i32 = arith.constant 0 : i32
    %c0_i32_0 = arith.constant 0 : i32
    %c0_i32_1 = arith.constant 0 : i32
    return %c0_i32, %c0_i32_0 : i32, i32
  }
  func.func @transform_11(%arg0: i32, %arg1: i32) -> (i32, i32) {
    %c0_i32 = arith.constant 0 : i32
    %c0_i32_0 = arith.constant 0 : i32
    %c0_i32_1 = arith.constant 0 : i32
    return %c0_i32, %c0_i32_0 : i32, i32
  }
  func.func @transform_12(%arg0: i32, %arg1: i32) -> (i32, i32) {
    %c0_i32 = arith.constant 0 : i32
    %c0_i32_0 = arith.constant 0 : i32
    %c0_i32_1 = arith.constant 0 : i32
    return %c0_i32, %c0_i32_0 : i32, i32
  }
  func.func @transform_13(%arg0: i32, %arg1: i32) -> (i32, i32) {
    %c0_i32 = arith.constant 0 : i32
    %c0_i32_0 = arith.constant 0 : i32
    %c0_i32_1 = arith.constant 0 : i32
    return %c0_i32, %c0_i32_0 : i32, i32
  }
  func.func @transform_14(%arg0: i32, %arg1: i32) -> (i32, i32) {
    %c0_i32 = arith.constant 0 : i32
    %c0_i32_0 = arith.constant 0 : i32
    %c0_i32_1 = arith.constant 0 : i32
    return %c0_i32, %c0_i32_0 : i32, i32
  }
  func.func @transform_15(%arg0: i32, %arg1: i32) -> (i32, i32) {
    %c0_i32 = arith.constant 0 : i32
    %c0_i32_0 = arith.constant 0 : i32
    %c0_i32_1 = arith.constant 0 : i32
    return %c0_i32, %c0_i32_0 : i32, i32
  }
  func.func @transform_16(%arg0: i32, %arg1: i32) -> (i32, i32, i32) {
    %c0_i32 = arith.constant 0 : i32
    %c0_i32_0 = arith.constant 0 : i32
    return %arg0, %arg1, %c0_i32 : i32, i32, i32
  }
}

</mosaic_0001>

<bundles_post_ra>
// kernel: tpu_custom_call.1
= control target key start
LH: loop header
LB: loop body
LE: loop exit
PB: predicated region body
PF: predicated region fallthrough
CT: control target
= control target key end

     0   :  { %s2724_s0 = inlined_call_operand.vmem [shape: f32[2,32,16], index: 0, kind: input, shape index: {}]   ;;  %s2725_s1 = inlined_call_operand.hbm [shape: f32[2,1,32], index: 1, kind: input, shape index: {}]   ;;  %s2726_s2 = inlined_call_operand.hbm [shape: f32[2,2,1,32], index: 2, kind: input, shape index: {}]   ;;  %s2727_s3 = inlined_call_operand.hbm [shape: f32[1,16], index: 3, kind: input, shape index: {}]   ;;  %s2728_s4 = inlined_call_operand.hbm [shape: f32[1,16], index: 4, kind: input, shape index: {}]   ;;  %s2729_s5 = inlined_call_operand.vmem [shape: f32[16,64], index: 5, kind: input, shape index: {}]   ;;  %s2730_s6 = inlined_call_operand.hbm [shape: f32[1,64], index: 6, kind: input, shape index: {}]   ;;  %s2731_s7 = inlined_call_operand.vmem [shape: f32[3,32], index: 7, kind: input, shape index: {}]   ;;  %s2732_s8 = inlined_call_operand.hbm [shape: f32[1,32], index: 8, kind: input, shape index: {}]   ;;  %s2733_s9 = inlined_call_operand.vmem [shape: f32[32,384], index: 9, kind: input, shape index: {}]   ;;  %s2734_s10 = inlined_call_operand.vmem [shape: f32[1,384], index: 10, kind: input, shape index: {}]   ;;  %s2735_s11 = inlined_call_operand.vmem [shape: f32[1,128], index: 11, kind: input, shape index: {}]   ;;  %s2736_s12 = inlined_call_operand.vmem [shape: f32[1,128], index: 12, kind: input, shape index: {}]   ;;  %s2737_s13 = inlined_call_operand.vmem [shape: f32[1,32], index: 13, kind: input, shape index: {}]   ;;  %s2738_s14 = inlined_call_operand.vmem [shape: f32[32,16], index: 14, kind: input, shape index: {}]   ;;  %s2739_s15 = inlined_call_operand.vmem [shape: f32[1,16], index: 15, kind: input, shape index: {}]   ;;  %s2740_s16 = inlined_call_operand.vmem [shape: f32[2,32,16], index: 16, kind: output, shape index: {}]  }
   0x1   :  { %2748 = sst [smem:[#allocation22_spill]] %s2724_s0 }
   0x2   :  { %2749 = sst [smem:[#allocation23_spill]] %s2725_s1 }
   0x3   :  { %2750 = sst [smem:[#allocation24_spill]] %s2727_s3 }
   0x4   :  { %2751 = sst [smem:[#allocation25_spill]] %s2728_s4 }
   0x5   :  { %2752 = sst [smem:[#allocation26_spill]] %s2729_s5 }
   0x6   :  { %2753 = sst [smem:[#allocation27_spill]] %s2730_s6 }
   0x7   :  { %2754 = sst [smem:[#allocation28_spill]] %s2731_s7 }
   0x8   :  { %2755 = sst [smem:[#allocation29_spill]] %s2732_s8 }
   0x9   :  { %2756 = sst [smem:[#allocation30_spill]] %s2733_s9 }
   0xa   :  { %2757 = sst [smem:[#allocation31_spill]] %s2734_s10 }
   0xb   :  { %2758 = sst [smem:[#allocation32_spill]] %s2735_s11 }
   0xc   :  { %2759 = sst [smem:[#allocation33_spill]] %s2736_s12 }
   0xd   :  { %2760 = sst [smem:[#allocation34_spill]] %s2737_s13 }
   0xe   :  { %2761 = sst [smem:[#allocation35_spill]] %s2738_s14 }
   0xf   :  { %2762 = sst [smem:[#allocation36_spill]] %s2739_s15 }
  0x10   :  { %2763 = sst [smem:[#allocation37_spill]] %s2740_s16 }
  0x11   :  { %21 = vsyncpa [#allocation5], 0 }
  0x12   :  { %23 = vsyncpa [#allocation5 + $0x1], 0 }
  0x13   :  { %24 = vsyncpa [#allocation7], 0 }
  0x14   :  { %26 = vsyncpa [#allocation7 + $0x1], 0 }
  0x15   :  { %27 = vsyncpa [#allocation10], 0 }
  0x16   :  { %28 = vsyncpa [#allocation13], 0  ;;  %s2209_s21 = smov 0   ;;  %s2211_s22 = smov 0  }
  0x17   :  { %s2213_s23 = smov 0   ;;  %s2215_s24 = smov 0  }
  0x18   :  { %s2217_s25 = smov 0   ;;  %s2219_s26 = smov 0  }
  0x19   :  { %s2221_s27 = smov 0   ;;  %s2223_s28 = smov 0  }
  0x1a   :  { %s2225_s29 = smov 0   ;;  %s2227_s30 = smov 0  }
  0x1b   :  { %s2229_s0 = smov 0  }
  0x1c LB: > { %2764 = sst [smem:[#allocation19_spill]] %s2098_s27  ;;  %s2742_s17 = sadd.s32 4294967295, %s2114_s0   ;;  %s2114_s0 = sphi %s2229_s0, %s34_s0   ;;  %s2110_s30 = sphi %s2227_s30, %s2802_s30   ;;  %s2106_s29 = sphi %s2225_s29, %s2801_s29   ;;  %s2102_s28 = sphi %s2223_s28, %s2800_s28   ;;  %s2098_s27 = sphi %s2221_s27, %s2799_s27   ;;  %s2094_s26 = sphi %s2219_s26, %s2798_s26   ;;  %s2090_s25 = sphi %s2217_s25, %s2797_s25   ;;  %s2086_s24 = sphi %s2215_s24, %s2796_s24   ;;  %s2082_s23 = sphi %s2213_s23, %s2795_s23   ;;  %s2078_s22 = sphi %s2211_s22, %s2794_s22   ;;  %s2074_s21 = sphi %s2209_s21, %s2793_s21  }
  0x1d   : > { %2765 = sst [smem:[#allocation20_spill]] %s2102_s28  ;;  %p1595_p0 = scmp.ge.s32.totalorder %s2114_s0, 1 }
  0x1e   : > { %p2268_p1 = scmp.eq.s32.totalorder %s2742_s17, 0  ;;  %p434_p2 = scmp.lt.s32.totalorder %s2114_s0, 5 }
  0x1f   : > { %s2767_s3 = sld [smem:[#allocation24_spill]]  ;;  %s2116_s14 = smov [#allocation8]  }
  0x20   : > { %p2276_p3 = pnand %p1595_p0, %p434_p2  ;;  %s448_s12 = sshll.u32 %s2116_s14, 4  ;;  %s449_s12 = int_to_ptr.vmem [resolvable:$true] %s448_s12 }
  0x21   : > { %s2769_s4 = sld [smem:[#allocation25_spill]]  ;;  %s2117_s14 = smov [#allocation9]  }
  0x22   : > { %p1664_p4 = pneg %p2276_p3  ;;  %s2771_s6 = sld [smem:[#allocation27_spill]] }
  0x23   : > { %s460_s9 = sshll.u32 %s2117_s14, 4  ;;  %s2772_s8 = sld [smem:[#allocation29_spill]]  ;;  %s461_s9 = int_to_ptr.vmem [resolvable:$true] %s460_s9 }
  0x24   : > { %p2287_p5 = pnand %p1664_p4, %p2268_p1  ;;  %s2118_s20 = smov [#allocation11]  }
  0x25   : > { %s446_s15 = sshll.u32 %s2767_s3, 4  ;;  %s475_s14 = sshll.u32 %s2118_s20, 4  ;;  %s447_s15 = int_to_ptr.hbm [resolvable:$true] %s446_s15  ;;  %s476_s14 = int_to_ptr.vmem [resolvable:$true] %s475_s14 }
  0x26   : > { %1667 = dma.hbm_to_vmem [thread:$0]  (!%p2287_p5), %s447_s15, 16, %s449_s12, [#allocation7]  }
  0x27   : > { %s458_s10 = sshll.u32 %s2769_s4, 4  ;;  %s2119_s12 = smov [#allocation12]   ;;  %s459_s10 = int_to_ptr.hbm [resolvable:$true] %s458_s10 }
  0x28   : > { %s473_s3 = sshll.u32 %s2771_s6, 4  ;;  %s490_s15 = sshll.u32 %s2119_s12, 4  ;;  %s474_s3 = int_to_ptr.hbm [resolvable:$true] %s473_s3  ;;  %s491_s15 = int_to_ptr.vmem [resolvable:$true] %s490_s15 }
  0x29   : > { %1670 = dma.hbm_to_vmem [thread:$0]  (!%p2287_p5), %s459_s10, 16, %s461_s9, [#allocation10]  }
  0x2a   : > { %s488_s19 = sshll.u32 %s2772_s8, 4  ;;  %s46_s9 = sadd.s32 1, %s2110_s30  ;;  %s489_s19 = int_to_ptr.hbm [resolvable:$true] %s488_s19 }
  0x2b   : > { %1673 = dma.hbm_to_vmem [thread:$0]  (!%p2287_p5), %s474_s3, 16, %s476_s14, [#allocation10]  }
  0x2c   : > { %1676 = dma.hbm_to_vmem [thread:$0]  (!%p2287_p5), %s489_s19, 16, %s491_s15, [#allocation13]  }
  0x2d   : > { %p88_p6 = scmp.ne.s32.totalorder %s2094_s26, %s2090_s25  ;;  %p89_p7 = scmp.eq.s32.totalorder %s2114_s0, 0 }
  0x2e   : > { %p94_p8 = scmp.ne.s32.totalorder %s2090_s25, %s2086_s24  ;;  %p1688_p9 = scmp.lt.s32.totalorder %s2114_s0, 4 }
  0x2f   : > { %p90_p10 = por %p89_p7, %p88_p6  ;;  %s535_s10 = sand.u32 1, %s2094_s26  }
  0x30   : > { %p2317_p11 = por %p2268_p1, %p94_p8  ;;  %s2774_s1 = sld [smem:[#allocation23_spill]] }
  0x31   : > { %s538_s19 = scalar_lea.vmem [#allocation4], %s535_s10  ;;  %p1678_p12 = pnand %p1688_p9, %p90_p10 }
  0x32   : > { %s545_s20 = sshll.u32 %s538_s19, 4  ;;  %s536_s14 = scalar_lea.sflag [#allocation5], %s535_s10  ;;  %s546_s20 = int_to_ptr.vmem [resolvable:$true] %s545_s20 }
  0x33   : > { %s81_s12 = sadd.s32 1, %s2094_s26  ;;  %s43_s15 = sadd.s32 1, %s2106_s29 }
  0x34   : > { %p44_p13 = scmp.ge.s32.totalorder %s43_s15, 2  ;;  %s109_s7 = sadd.s32 1, %s2082_s23 }
  0x35   : > { %p116_p0 = scmp.ne.s32.totalorder %s2082_s23, %s2078_s22  ;;  %p122_p2 = scmp.ne.s32.totalorder %s2078_s22, %s2074_s21 }
  0x36   : > { %s541_s17 = scalar_lea.hbm %s2774_s1, %s2110_s30  ;;  %s2804_s15 = smov (%p44_p13, %s43_s15), 0 }
  0x37   : > { %s543_s24 = sshll.u32 %s541_s17, 4  ;;  %2775 = sst [smem:[#allocation21_spill]] %s2804_s15  ;;  %s544_s24 = int_to_ptr.hbm [resolvable:$true] %s543_s24 }
  0x38   : > { %1680 = dma.hbm_to_vmem [thread:$0]  (!%p1678_p12), %s544_s24, 16, %s546_s20, %s536_s14  }
  0x39   : > { %s2806_s9 = smov (!%p44_p13, %s46_s9), %s2110_s30  ;;  %s105_s11 = ssub.s32 %s2106_s29, %s2804_s15 }
  0x3a   : > { %s552_s17 = sand.u32 1, %s2114_s0   ;;  %p48_p4 = scmp.ge.s32.totalorder %s2806_s9, 2 }
  0x3b   : > { %p2342_p5 = por %p122_p2, %p2268_p1  ;;  %p2348_p6 = por %p116_p0, %p89_p7 }
  0x3c   : > { %s554_s21 = sand.u32 1, %s2082_s23   ;;  %s2808_s9 = smov (%p48_p4, %s2806_s9), 0 }
  0x3d   : > { %s1601_s19 = sshll.u32 %s2110_s30, 1  ;;  %s78_s20 = ssub.s32 %s2110_s30, %s2808_s9 }
  0x3e   : > { %s559_s14 = sadd.s32 %s2106_s29, %s1601_s19  ;;  %p79_p8 = scmp.eq.s32.totalorder %s78_s20, 0 }
  0x3f   : > { %s106_s1 = sor.u32 %s105_s11, %s78_s20  ;;  %s560_s8 = scalar_lea.hbm %s2726_s2, %s559_s14 }
  0x40   : > { %p107_p10 = scmp.eq.s32.totalorder %s106_s1, 0  ;;  %s562_s16 = sshll.u32 %s560_s8, 4  ;;  %s563_s16 = int_to_ptr.hbm [resolvable:$true] %s562_s16 }
  0x41   : > { %s2363_s15 = scalar_select %p79_p8, %s2094_s26, %s81_s12  }
  0x42   : > { %s2366_s5 = scalar_select %p107_p10, %s2082_s23, %s109_s7  }
  0x43   : > { %s555_s28 = scalar_lea.vmem [#allocation6], %s554_s21  ;;  %p1681_p7 = pnand %p1688_p9, %p2348_p6 }
  0x44   : > { %s564_s27 = sshll.u32 %s555_s28, 4  ;;  %s553_s19 = scalar_lea.sflag [#allocation7], %s552_s17  ;;  %s565_s27 = int_to_ptr.vmem [resolvable:$true] %s564_s27 }
  0x45   : > { %1683 = dma.hbm_to_vmem [thread:$0]  (!%p1681_p7), %s563_s16, 16, %s565_s27, %s553_s19  }
  0x46   : > { %573 = sbr.rel (%p2276_p3) target bundleno = 1148 (0x47c), region = 84  ;;  %s575_s1 = sand.u32 (!%p2276_p3), 1, %s2090_s25  }
  0x47   : > { %s576_s4 = scalar_lea.sflag (!%p2276_p3), [#allocation5], %s575_s1  ;;  %s2375_s6 = scalar_lea.vmem (!%p2276_p3), [#allocation4], %s575_s1 }
  0x4b   : > { %2053 = dma.done.wait (%p2317_p11), %s576_s4, 16  }
  0x4c   : > { %2055 = vsyncadd (%p2317_p11), %s576_s4, 4294967280  ;;  %s2778_s8 = sadd.s32 4294967295, %s2114_s0   ;;  %s586_s16 = sand.u32 1, %s2078_s22  }
  0x4d   : > { %s584_s28 = sand.u32 1, %s2778_s8   ;;  %s2384_s13 = scalar_lea.vmem [#allocation6], %s586_s16 }
  0x4e   : > { %s585_s27 = scalar_lea.sflag [#allocation7], %s584_s28 }
  0x4f   : > { %2057 = dma.done.wait (%p2342_p5), %s585_s27, 16  }
  0x50   : > { %2059 = vsyncadd (%p2342_p5), %s585_s27, 4294967280 }
  0x51   : > { %2061 = dma.done.wait (%p2268_p1), [#allocation7], 16  }
  0x52   : > { %2063 = vsyncadd (%p2268_p1), [#allocation7], 4294967280 }
  0x53   : > { %2065 = dma.done.wait (%p2268_p1), [#allocation10], 32  }
  0x54   : > { %2067 = vsyncadd (%p2268_p1), [#allocation10], 4294967264 }
  0x55   : > { %2069 = dma.done.wait (%p2268_p1), [#allocation13], 16  }
  0x56   : > { %2071 = vsyncadd (%p2268_p1), [#allocation13], 4294967280  ;;  %s2779_s3 = sld [smem:[#allocation19_spill]] }
  0x57   : > { %s2780_s12 = sld [smem:[#allocation20_spill]] }
  0x58   : > { %s2781_s20 = sld [smem:[#allocation22_spill]] }
  0x59   : > { %s2782_s4 = sld [smem:[#allocation37_spill]] }
  0x5c   : > { %s1607_s7 = sshll.u32 %s2779_s3, 1  ;;  %p1613_p1 = scmp.ne.s32.totalorder %s2779_s3, 0 }
  0x5d   : > { %p674_p3 = scmp.lt.s32.totalorder %s2780_s12, 1  ;;  %p676_p9 = scmp.lt.s32.totalorder %s1607_s7, 3 }
  0x5f   : > { %s2810_s12 = smov (!%p674_p3, %s2780_s12), 1  ;;  %s2812_s7 = smov (!%p676_p9, %s1607_s7), 3 }
  0x60   : > { %s1608_s11 = sshll.u32 %s2810_s12, 2  ;;  %696 = sbr.rel (%p1613_p1) target bundleno = 104 (0x68), region = 112 }
  0x61   : > { %s679_s17 = sadd.s32 %s1608_s11, %s2812_s7 }
  0x62   : > { %s1609_s10 = sshll.u32 %s679_s17, 3 }
  0x63   : > { %s681_s14 = scalar_lea.vmem %s2781_s20, %s1609_s10  ;;  %s2411_s18 = scalar_lea.vmem %s2782_s4, %s1609_s10 }
  0x65   : > { %vm698_vm0 = vcmask 253952   ;;  %v2120_v0 = vmov 0.0  }
  0x66   : > { %697 = vst [vmem:[#allocation2] sm:$0x1] %v2120_v0 }
  0x67   : > { %699 = vst.msk [vmem:[#allocation3] sm:$0x1] %vm698_vm0, %v2120_v0 }
  0x68 PF: > { %v2414_v1 = vld [vmem:[%s681_s14] sm:$0xff]  ;;  %vm704_vm1 = vcmask 130048   ;;  %v2418_v3 = vld [vmem:[%s681_s14 + $0x8] sm:$0xff]  ;;  %v2121_v5 = vmov 16.0   ;;  %s2783_s16 = sld [smem:[#allocation26_spill]]  ;;  %v805_v0 = vlaneseq  ;;  %vm803_vm9 = vcmask 261127  }
  0x69   : > { %v705_v2 = vsel %vm704_vm1, %v2414_v1, 0.0  ;;  %v708_v4 = vsel %vm704_vm1, %v2418_v3, 0.0  ;;  %1798 = vrcp.f32 %v2121_v5  ;;  %v1789_v38 = vld [vmem:[#allocation8] ss:$0 sm:$0xff]  ;;  %v1790_v42 = vld [vmem:[#allocation9] ss:$0 sm:$0xff] }
  0x6a   : > { %706 = vadd.xlane.f32.xlu0 %v705_v2  ;;  %s2784_s11 = sld [smem:[#allocation30_spill]]  ;;  %v806_v2 = vshrl.u32 %v805_v0, 7  ;;  %vm896_vm14 = vcmask 261120   ;;  %s2122_s7 = smov 96  }
  0x6b   : > { %s2785_s8 = sld [smem:[#allocation28_spill]] }
  0x6c   : > { %vm812_vm10 = vcmp.lt.s32.totalorder %v806_v2, 1  ;;  %vm828_vm11 = vcmp.lt.s32.totalorder %v806_v2, 7  ;;  %vm808_vm12 = vcmp.eq.s32.totalorder %v806_v2, 0  ;;  %s2786_s28 = sld [smem:[#allocation31_spill]] }
  0x6d   : > { %s2787_s12 = sld [smem:[#allocation32_spill]] }
  0x6e   : > { %v767_v22 = vld [vmem:[%s2783_s16 + $0x8] sm:$0xff]  ;;  %v766_v23 = vld [vmem:[%s2783_s16] sm:$0xff]  ;;  %s2788_s24 = sld [smem:[#allocation33_spill]] }
  0x6f   : > { %v1799_v6 = vpop.eup %1798  ;;  %792 = vmatpush.msra.mxu0 %v767_v22  ;;  %1642 = vmatpush.msra.mxu1 %v767_v22  ;;  %s2789_s14 = sld [smem:[#allocation35_spill]] }
  0x70   : > { %v712_v7 = vmul.f32 16.0, %v1799_v6  ;;  %vm716_vm2 = vweird.f32 %v1799_v6  ;;  %v885_v52 = vld [vmem:[%s2784_s11 + $0x48] sm:$0xff]  ;;  %v886_v53 = vld [vmem:[%s2784_s11 + $0x50] sm:$0xff]  ;;  %v887_v54 = vld [vmem:[%s2784_s11 + $0x58] sm:$0xff]  ;;  %s2790_s3 = sld [smem:[#allocation34_spill]] }
  0x71   : > { %793 = vmatpush.msra.mxu0 %v766_v23  ;;  %1643 = vmatpush.msra.mxu1 %v766_v23  ;;  %v882_v55 = vld [vmem:[%s2784_s11 + $0x30] sm:$0xff]  ;;  %v883_v56 = vld [vmem:[%s2784_s11 + $0x38] sm:$0xff]  ;;  %v884_v57 = vld [vmem:[%s2784_s11 + $0x40] sm:$0xff]  ;;  %s2791_s17 = sld [smem:[#allocation36_spill]] }
  0x72   : > { %709 = vadd.xlane.f32.xlu0 %v708_v4  ;;  %v713_v8 = vsub.f32 1.0, %v712_v7  ;;  %938 = vmatpush.msra.mxu2 %v886_v53  ;;  %v879_v58 = vld [vmem:[%s2784_s11 + $0x18] sm:$0xff]  ;;  %v880_v59 = vld [vmem:[%s2784_s11 + $0x20] sm:$0xff]  ;;  %v881_v60 = vld [vmem:[%s2784_s11 + $0x28] sm:$0xff]  ;;  %v807_v7 = vadd.s32 8, %v806_v2 }
  0x73   : > { %915 = vmatpush.msrb.mxu1 %v885_v52  ;;  %961 = vmatpush.msra.mxu3 %v887_v54  ;;  %v876_v61 = vld [vmem:[%s2784_s11] sm:$0xff]  ;;  %v877_v62 = vld [vmem:[%s2784_s11 + $0x8] sm:$0xff]  ;;  %v878_v63 = vld [vmem:[%s2784_s11 + $0x10] sm:$0xff] }
  0x74   : > { %v714_v9 = vmul.f32 %v1799_v6, %v713_v8  ;;  %939 = vmatpush.msra.mxu2 %v883_v56  ;;  %v1791_v4 = vld [vmem:[#allocation11] ss:$0 sm:$0xff]  ;;  %vm825_vm13 = vcmp.eq.s32.totalorder %v807_v7, 15  ;;  %v2507_v54 = vld [vmem:[%s2786_s28] sm:$0x7] }
  0x75   : > { %916 = vmatpush.msrb.mxu1 %v882_v55  ;;  %962 = vmatpush.msra.mxu3 %v884_v57  ;;  %v890_v55 = vperm.slane %v2507_v54, 0  ;;  %v1795_v56 = vld [vmem:[%s2787_s12] ss:$0 sm:$0xff] }
  0x76   : > { %v715_v10 = vadd.f32 %v1799_v6, %v714_v9  ;;  %940 = vmatpush.msra.mxu2 %v880_v59  ;;  %v801_v9 = vld [vmem:[#allocation3] sm:$0x1] }
  0x77   : > { %917 = vmatpush.msrb.mxu1 %v879_v58  ;;  %963 = vmatpush.msra.mxu3 %v881_v60 }
  0x78   : > { %v717_v11 = vsel %vm716_vm2, %v1799_v6, %v715_v10  ;;  %941 = vmatpush.msra.mxu2 %v877_v62  ;;  %v840_v6 = vld [vmem:[%s2785_s8] sm:$0x7] }
  0x79   : > { %918 = vmatpush.msrb.mxu1 %v876_v61  ;;  %964 = vmatpush.msra.mxu3 %v878_v63  ;;  %v844_v10 = vperm.slane %v840_v6, 1 }
  0xdd   : > { %v707_v12 = vpop.xlane.xlu0 %706 }
  0xde   : > { %v718_v13 = vmul.f32 %v717_v11, %v707_v12  ;;  %v841_v12 = vperm.slane %v840_v6, 0 }
  0xe0   : > { %v720_v14 = vsub.f32 %v2414_v1, %v718_v13  ;;  %v849_v13 = vperm.slane %v840_v6, 2 }
  0xe2   : > { %v722_v15 = vmul.f32 %v720_v14, %v720_v14 }
  0xe4   : > { %v724_v16 = vsel %vm704_vm1, %v722_v15, 0.0  ;;  %v820_v15 = vperm.slane %v801_v9, 0 }
  0xe5   : > { %725 = vadd.xlane.f32.xlu1 %v724_v16  ;;  %v710_v17 = vpop.xlane.xlu0 %709  ;;  %v1794_v16 = vld [vmem:[%s2384_s13] ss:$0 sm:$0xff] }
  0xe6   : > { %v719_v18 = vmul.f32 %v717_v11, %v710_v17 }
  0xe8   : > { %v721_v19 = vsub.f32 %v2418_v3, %v719_v18 }
  0xea   : > { %v723_v20 = vmul.f32 %v721_v19, %v721_v19 }
  0xec   : > { %v727_v21 = vsel %vm704_vm1, %v723_v20, 0.0 }
  0xed   : > { %728 = vadd.xlane.f32.xlu1 %v727_v21 }
 0x158   : > { %v726_v24 = vpop.xlane.xlu1 %725 }
 0x159   : > { %v730_v25 = vmul.f32 %v726_v24, %v717_v11 }
 0x15b   : > { %v732_v26 = vadd.f32 1e-05, %v730_v25 }
 0x15d   : > { %1800 = vrsqrt.f32 %v732_v26  ;;  %vm740_vm4 = vweird.f32 %v732_v26 }
 0x160   : > { %v729_v27 = vpop.xlane.xlu1 %728 }
 0x161   : > { %v731_v28 = vmul.f32 %v729_v27, %v717_v11 }
 0x163   : > { %v1801_v29 = vpop.eup %1800  ;;  %v733_v30 = vadd.f32 1e-05, %v731_v28 }
 0x164   : > { %v735_v31 = vmul.f32 %v1801_v29, %v732_v26  ;;  %vm741_vm3 = vweird.f32 %v1801_v29 }
 0x165   : > { %1802 = vrsqrt.f32 %v733_v30  ;;  %vm742_vm5 = vmor %vm740_vm4, %vm741_vm3  ;;  %vm750_vm7 = vweird.f32 %v733_v30 }
 0x166   : > { %v736_v32 = vmul.f32 %v1801_v29, %v735_v31 }
 0x168   : > { %v737_v33 = vmul.f32 0.5, %v736_v32 }
 0x16a   : > { %v738_v34 = vsub.f32 1.5, %v737_v33  ;;  %v1792_v33 = vld [vmem:[#allocation12] ss:$0 sm:$0xff] }
 0x16b   : > { %v1803_v35 = vpop.eup %1802 }
 0x16c   : > { %v739_v36 = vmul.f32 %v1801_v29, %v738_v34  ;;  %v745_v37 = vmul.f32 %v1803_v35, %v733_v30  ;;  %vm751_vm6 = vweird.f32 %v1803_v35 }
 0x16d   : > { %vm752_vm8 = vmor %vm750_vm7, %vm751_vm6  ;;  %vm1231_vm6 = vcmask 1041408   ;;  %vm1233_vm7 = vcmask 1042432  }
 0x16e   : > { %v743_v39 = vsel %vm742_vm5, %v1801_v29, %v739_v36  ;;  %v746_v40 = vmul.f32 %v1803_v35, %v745_v37  ;;  %vm1229_vm5 = vcmask 1040384  }
 0x16f   : > { %v754_v41 = vmul.f32 %v743_v39, %v720_v14 }
 0x170   : > { %v747_v43 = vmul.f32 0.5, %v746_v40 }
 0x171   : > { %v759_v44 = vmul.f32 %v1789_v38, %v754_v41 }
 0x172   : > { %v748_v45 = vsub.f32 1.5, %v747_v43 }
 0x173   : > { %v764_v46 = vadd.f32 %v1790_v42, %v759_v44 }
 0x174   : > { %v749_v47 = vmul.f32 %v1803_v35, %v748_v45 }
 0x175   : > { %1614 = vmatmul.msk.f32.vlgmr.msra.gmra.mxu0 %vm704_vm1, %v764_v46  ;;  %v1793_v46 = vld [vmem:[%s2375_s6] ss:$0 sm:$0xff] }
 0x176   : > { %v753_v48 = vsel %vm752_vm8, %v1803_v35, %v749_v47  ;;  %vm1235_vm8 = vcmask 1043456  }
 0x177   : > { %v755_v49 = vmul.f32 %v753_v48, %v721_v19 }
 0x179   : > { %v760_v50 = vmul.f32 %v1789_v38, %v755_v49 }
 0x17b   : > { %v765_v51 = vadd.f32 %v1790_v42, %v760_v50 }
 0x17d   : > { %1615 = vmatmul.msk.f32.vlgmr.msra.gmra.mxu1 %vm704_vm1, %v765_v51 }
 0x1f2   : > { %v795_v5 = vpop.f32.mrf.mxu0 }
 0x1f3   : > { %v2473_v8 = vadd.f32 %v1791_v4, %v795_v5 }
 0x1f5   : > { %v810_v17 = vrot.slane %v2473_v8, 7  ;;  %v826_v18 = vrot.slane %v2473_v8, 1  ;;  %v845_v29 = vmul.f32 %v844_v10, %v2473_v8 }
 0x1fa   : > { %v798_v11 = vpop.f32.mrf.mxu1 }
 0x1fb   : > { %v2475_v14 = vadd.f32 %v1791_v4, %v798_v11 }
 0x1fd   : > { %804 = vst.msk [vmem:[#allocation3 - $0x7] sm:$0x80] %vm803_vm9, %v2475_v14  ;;  %v811_v19 = vrot.slane %v2475_v14, 7  ;;  %v827_v20 = vrot.slane %v2475_v14, 1  ;;  %v846_v24 = vmul.f32 %v844_v10, %v2475_v14  ;;  %vm1237_vm9 = vcmask 1044480  }
 0x1ff   : > { %v813_v21 = vsel %vm812_vm10, %v810_v17, %v811_v19  ;;  %v814_v22 = vsel %vm812_vm10, %v811_v19, %v810_v17  ;;  %v830_v23 = vsel %vm828_vm11, %v827_v20, %v826_v18  ;;  %v829_v27 = vsel %vm828_vm11, %v826_v18, %v827_v20 }
 0x200   : > { %v843_v25 = vmul.f32 %v841_v12, %v813_v21  ;;  %v822_v26 = vsel %vm808_vm12, %v820_v15, %v814_v22  ;;  %v839_v28 = vsel %vm825_vm13, %v1794_v16, %v830_v23  ;;  %v850_v35 = vmul.f32 %v849_v13, %v829_v27 }
 0x201   : > { %v842_v30 = vmul.f32 %v841_v12, %v822_v26  ;;  %v851_v31 = vmul.f32 %v849_v13, %v839_v28  ;;  %v1364_v23 = vmul.f32 0.5, %v2473_v8  ;;  %vm1239_vm10 = vcmask 1045504  }
 0x202   : > { %v848_v32 = vadd.f32 %v846_v24, %v843_v25  ;;  %vm1241_vm11 = vcmask 1046528  }
 0x203   : > { %v847_v34 = vadd.f32 %v845_v29, %v842_v30 }
 0x204   : > { %v853_v36 = vadd.f32 %v851_v31, %v848_v32  ;;  %v972_v31 = vld [vmem:[%s2788_s24] sm:$0x1] }
 0x205   : > { %v852_v37 = vadd.f32 %v850_v35, %v847_v34  ;;  %v973_v32 = vmul.f32 1.442695, %v972_v31 }
 0x206   : > { %v859_v38 = vadd.f32 %v1792_v33, %v853_v36 }
 0x207   : > { %v858_v39 = vadd.f32 %v1792_v33, %v852_v37  ;;  %v2123_v33 = vmov 32.0  }
 0x208   : > { %v861_v40 = vmul.f32 0.5, %v859_v38 }
 0x209   : > { %v860_v41 = vmul.f32 0.5, %v858_v39 }
 0x20a   : > { %1804 = vtanh.f32 %v861_v40 }
 0x20b   : > { %1806 = vtanh.f32 %v860_v41 }
 0x210   : > { %v1805_v42 = vpop.eup %1804 }
 0x211   : > { %v1807_v43 = vpop.eup %1806  ;;  %v865_v44 = vmul.f32 0.5, %v1805_v42  ;;  %v891_v42 = vperm.slane %v2507_v54, 1 }
 0x212   : > { %v864_v45 = vmul.f32 0.5, %v1807_v43 }
 0x213   : > { %v867_v47 = vadd.f32 0.5, %v865_v44 }
 0x214   : > { %v866_v48 = vadd.f32 0.5, %v864_v45 }
 0x215   : > { %v869_v49 = vmul.f32 %v867_v47, %v859_v38 }
 0x216   : > { %v868_v50 = vmul.f32 %v866_v48, %v858_v39 }
 0x217   : > { %v2486_v51 = vadd.f32 %v1793_v46, %v869_v49 }
 0x218   : > { %v2488_v52 = vadd.f32 %v1793_v46, %v868_v50 }
 0x219   : > { %v1026_v53 = vsel %vm896_vm14, %v2486_v51, 0.0 }
 0x21a   : > { %1616 = vmatmul.msk.f32.vlgmr.msrb.gmra.mxu1 %vm896_vm14, %v2488_v52  ;;  %1618 = vmatmul.msk.f32.vlgmr.msra.gmra.mxu2 %vm896_vm14, %v2488_v52  ;;  %v1023_v25 = vsel %vm896_vm14, %v2488_v52, 0.0 }
 0x21b   : > { %1620 = vmatmul.msk.f32.vlgmr.msra.gmra.mxu3 %vm896_vm14, %v2488_v52  ;;  %1027 = vadd.xlane.f32.xlu1 %v1026_v53 }
 0x222   : > { %1617 = vmatmul.msk.f32.gmra.mxu1 %vm896_vm14, %v2486_v51  ;;  %1619 = vmatmul.msk.f32.gmra.mxu2 %vm896_vm14, %v2486_v51 }
 0x223   : > { %1621 = vmatmul.msk.f32.gmra.mxu3 %vm896_vm14, %v2486_v51 }
 0x297   : > { %v920_v57 = vpop.f32.mrf.mxu1 }
 0x298   : > { %v921_v58 = vadd.f32 %v920_v57, %v890_v55 }
 0x29a   : > { %v980_v59 = vadd.f32 %v1795_v56, %v921_v58 }
 0x29c   : > { %v984_v60 = vmul.f32 1.442695, %v980_v59  ;;  %vm982_vm0 = vcmp.gt.f32.partialorder %v980_v59, 20.0 }
 0x29d   : > { %v943_v45 = vpop.f32.mrf.mxu2 }
 0x29e   : > { %1808 = vpow2.f32 %v984_v60  ;;  %v944_v47 = vadd.f32 %v943_v45, %v891_v42 }
 0x29f   : > { %v923_v61 = vpop.f32.mrf.mxu1 }
 0x2a0   : > { %v924_v62 = vadd.f32 %v923_v61, %v890_v55 }
 0x2a2   : > { %v981_v63 = vadd.f32 %v1795_v56, %v924_v62 }
 0x2a4   : > { %v1809_v0 = vpop.eup %1808  ;;  %v986_v2 = vmul.f32 1.442695, %v981_v63  ;;  %vm983_vm3 = vcmp.gt.f32.partialorder %v981_v63, 20.0 }
 0x2a5   : > { %v988_v4 = vadd.f32 1.0, %v1809_v0  ;;  %v991_v5 = vmul.f32 -0.5, %v1809_v0  ;;  %v994_v7 = vand.u32 2147483647, %v1809_v0  ;;  %v946_v60 = vpop.f32.mrf.mxu2 }
 0x2a6   : > { %1810 = vpow2.f32 %v986_v2 }
 0x2a7   : > { %1812 = vlog2.f32 %v988_v4  ;;  %v992_v6 = vadd.f32 1.0, %v991_v5  ;;  %vm995_vm15 = vcmp.lt.f32.partialorder %v994_v7, 0.0004427343 }
 0x2a9   : > { %v993_v13 = vmul.f32 %v1809_v0, %v992_v6 }
 0x2ac   : > { %v1811_v9 = vpop.eup %1810 }
 0x2ad   : > { %v1813_v10 = vpop.eup %1812  ;;  %v997_v11 = vadd.f32 1.0, %v1811_v9  ;;  %v1000_v15 = vmul.f32 -0.5, %v1811_v9  ;;  %v1003_v19 = vand.u32 2147483647, %v1811_v9 }
 0x2ae   : > { %v990_v12 = vmul.f32 0.6931472, %v1813_v10  ;;  %v947_v10 = vadd.f32 %v946_v60, %v891_v42 }
 0x2af   : > { %1814 = vlog2.f32 %v997_v11  ;;  %v1001_v18 = vadd.f32 1.0, %v1000_v15  ;;  %vm1004_vm2 = vcmp.lt.f32.partialorder %v1003_v19, 0.0004427343 }
 0x2b0   : > { %v996_v16 = vsel %vm995_vm15, %v993_v13, %v990_v12  ;;  %1816 = vtanh.f32 %v1364_v23  ;;  %v1028_v13 = vpop.xlane.xlu1 %1027 }
 0x2b1   : > { %v1006_v17 = vsel %vm982_vm0, %v980_v59, %v996_v16  ;;  %v1002_v22 = vmul.f32 %v1811_v9, %v1001_v18  ;;  %1818 = vrcp.f32 %v2123_v33 }
 0x2b2   : > { %1008 = vadd.xlane.f32.xlu2 %v1006_v17  ;;  %1820 = vpow2.f32 %v973_v32 }
 0x2b5   : > { %v1815_v20 = vpop.eup %1814 }
 0x2b6   : > { %v999_v21 = vmul.f32 0.6931472, %v1815_v20  ;;  %v1817_v27 = vpop.eup %1816 }
 0x2b7   : > { %v1368_v28 = vmul.f32 0.5, %v1817_v27  ;;  %v1819_v34 = vpop.eup %1818  ;;  %v2556_v27 = vld [vmem:[#allocation2] sm:$0x1] }
 0x2b8   : > { %v1005_v24 = vsel %vm1004_vm2, %v1002_v22, %v999_v21  ;;  %v1821_v35 = vpop.eup %1820  ;;  %v1030_v36 = vmul.f32 32.0, %v1819_v34  ;;  %vm1034_vm4 = vweird.f32 %v1819_v34 }
 0x2b9   : > { %v1007_v26 = vsel %vm983_vm3, %v981_v63, %v1005_v24  ;;  %v1370_v29 = vadd.f32 0.5, %v1368_v28  ;;  %v975_v37 = vsub.f32 0.0, %v1821_v35 }
 0x2ba   : > { %1024 = vadd.xlane.f32.xlu2 %v1023_v25  ;;  %1010 = vadd.xlane.f32.xlu0 %v1007_v26  ;;  %v1031_v38 = vsub.f32 1.0, %v1030_v36 }
 0x2bb   : > { %v1372_v30 = vmul.f32 %v1370_v29, %v2473_v8  ;;  %v1015_v39 = vperm.slane %v975_v37, 0 }
 0x2bc   : > { %v1032_v40 = vmul.f32 %v1819_v34, %v1031_v38 }
 0x2be   : > { %v1033_v44 = vadd.f32 %v1819_v34, %v1032_v40 }
 0x2c0   : > { %v1035_v48 = vsel %vm1034_vm4, %v1819_v34, %v1033_v44 }
 0x2c1   : > { %v1037_v23 = vmul.f32 %v1035_v48, %v1028_v13 }
 0x2ce   : > { %1376 = vrot.lane.b32.xlu0 %v1372_v30, %s2122_s7 }
 0x325   : > { %v1009_v41 = vpop.xlane.xlu2 %1008 }
 0x326   : > { %v1012_v8 = vmul.f32 0.03125, %v1009_v41 }
 0x328   : > { %v1017_v43 = vmul.f32 %v1015_v39, %v1012_v8  ;;  %v1038_v53 = vmul.f32 %v1012_v8, %v944_v47 }
 0x32a   : > { %v1019_v46 = vmul.f32 1.442695, %v1017_v43 }
 0x32c   : > { %1822 = vpow2.f32 %v1019_v46 }
 0x32d   : > { %v1025_v49 = vpop.xlane.xlu2 %1024  ;;  %v1011_v50 = vpop.xlane.xlu0 %1010 }
 0x32e   : > { %v1036_v55 = vmul.f32 %v1035_v48, %v1025_v49  ;;  %v1013_v56 = vmul.f32 0.03125, %v1011_v50 }
 0x330   : > { %v2522_v57 = vmul.f32 %v1038_v53, %v1036_v55  ;;  %v1018_v58 = vmul.f32 %v1015_v39, %v1013_v56  ;;  %v1039_v19 = vmul.f32 %v1013_v56, %v947_v10 }
 0x332   : > { %v2524_v59 = vpop.eup %1822  ;;  %v2537_v2 = vrot.slane %v2522_v57, 2  ;;  %v2540_v4 = vrot.slane %v2522_v57, 4  ;;  %v1021_v9 = vmul.f32 1.442695, %v1018_v58  ;;  %v2548_v15 = vrot.slane %v2522_v57, 6 }
 0x333   : > { %v2527_v61 = vrot.slane %v2524_v59, 2  ;;  %v2530_v62 = vrot.slane %v2524_v59, 4  ;;  %v2533_v63 = vrot.slane %v2524_v59, 6  ;;  %v1070_v0 = vmul.f32 0.0, %v2524_v59 }
 0x334   : > { %v1622_v11 = vrot.slane %v2524_v59, 9  ;;  %1824 = vpow2.f32 %v1021_v9  ;;  %v2560_v30 = vmul.f32 %v1039_v19, %v1037_v23 }
 0x335   : > { %v1071_v5 = vmul.f32 0.0, %v2527_v61  ;;  %v1072_v6 = vmul.f32 0.0, %v2530_v62  ;;  %v1073_v7 = vmul.f32 0.0, %v2533_v63  ;;  %v1078_v12 = vadd.f32 %v1070_v0, %v2522_v57 }
 0x336   : > { %v1150_v24 = vmul.f32 %v2524_v59, %v1622_v11  ;;  %v1623_v26 = vrot.slane %v2527_v61, 9  ;;  %v1624_v37 = vrot.slane %v2530_v62, 9  ;;  %v2576_v8 = vrot.slane %v2560_v30, 2 }
 0x337   : > { %v1079_v16 = vadd.f32 %v1071_v5, %v2537_v2  ;;  %v1080_v17 = vadd.f32 %v1072_v6, %v2540_v4  ;;  %v1094_v18 = vrot.slane %v1078_v12, 7  ;;  %v1081_v20 = vadd.f32 %v1073_v7, %v2548_v15 }
 0x338   : > { %v1159_v33 = vmul.f32 %v2556_v27, %v1150_v24  ;;  %v1151_v38 = vmul.f32 %v1623_v26, %v2527_v61  ;;  %v1625_v50 = vrot.slane %v2533_v63, 9  ;;  %v1152_v55 = vmul.f32 %v1624_v37, %v2530_v62 }
 0x339   : > { %v1095_v21 = vrot.slane %v1079_v16, 7  ;;  %v1096_v22 = vrot.slane %v1080_v17, 7  ;;  %v1110_v25 = vmul.f32 %v2524_v59, %v1094_v18  ;;  %v1097_v31 = vrot.slane %v1081_v20, 7 }
 0x33a   : > { %v2565_v36 = vpop.eup %1824  ;;  %v2590_v58 = vrot.slane %v2560_v30, 4  ;;  %v2597_v12 = vrot.slane %v2560_v30, 6  ;;  %v1153_v17 = vmul.f32 %v1625_v50, %v2533_v63 }
 0x33b   : > { %v1111_v28 = vmul.f32 %v1095_v21, %v2527_v61  ;;  %v1118_v29 = vadd.f32 %v1110_v25, %v2522_v57  ;;  %v1112_v32 = vmul.f32 %v1096_v22, %v2530_v62  ;;  %v2570_v40 = vrot.slane %v2565_v36, 2 }
 0x33c   : > { %v2573_v41 = vrot.slane %v2565_v36, 4  ;;  %v1113_v42 = vmul.f32 %v1097_v31, %v2533_v63  ;;  %v2581_v44 = vrot.slane %v2565_v36, 6  ;;  %v1074_v45 = vmul.f32 0.0, %v2565_v36 }
 0x33d   : > { %v1119_v34 = vadd.f32 %v1111_v28, %v2537_v2  ;;  %v1630_v35 = vrot.slane %v1118_v29, 9  ;;  %v1120_v43 = vadd.f32 %v1112_v32, %v2540_v4  ;;  %v1075_v48 = vmul.f32 0.0, %v2570_v40 }
 0x33e   : > { %v1076_v49 = vmul.f32 0.0, %v2573_v41  ;;  %v1082_v53 = vadd.f32 %v1074_v45, %v2560_v30  ;;  %v1121_v0 = vadd.f32 %v1113_v42, %v2548_v15  ;;  %v1077_v5 = vmul.f32 0.0, %v2581_v44 }
 0x33f   : > { %v1164_v39 = vadd.f32 %v1630_v35, %v1159_v33  ;;  %v1631_v47 = vrot.slane %v1119_v34, 9  ;;  %v1083_v60 = vadd.f32 %v1075_v48, %v2576_v8  ;;  %v1632_v9 = vrot.slane %v1120_v43, 9 }
 0x340   : > { %v1098_v6 = vrot.slane %v1082_v53, 7  ;;  %v1084_v10 = vadd.f32 %v1076_v49, %v2590_v58  ;;  %v1626_v18 = vrot.slane %v2565_v36, 9  ;;  %v1633_v19 = vrot.slane %v1121_v0, 9 }
 0x341   : > { %v1165_v46 = vmul.f32 %v1164_v39, %v1151_v38  ;;  %v1099_v11 = vrot.slane %v1083_v60, 7  ;;  %v1085_v20 = vadd.f32 %v1077_v5, %v2597_v12  ;;  %v1627_v26 = vrot.slane %v2570_v40, 9 }
 0x342   : > { %v1114_v13 = vmul.f32 %v2565_v36, %v1098_v6  ;;  %v1100_v22 = vrot.slane %v1084_v10, 7  ;;  %v1154_v28 = vmul.f32 %v2565_v36, %v1626_v18  ;;  %v1628_v35 = vrot.slane %v2573_v41, 9 }
 0x343   : > { %v1170_v56 = vadd.f32 %v1631_v47, %v1165_v46  ;;  %v1115_v23 = vmul.f32 %v1099_v11, %v2570_v40  ;;  %v1101_v29 = vrot.slane %v1085_v20, 7  ;;  %v1155_v37 = vmul.f32 %v1627_v26, %v2570_v40 }
 0x344   : > { %v1122_v24 = vadd.f32 %v1114_v13, %v2560_v30  ;;  %v1116_v31 = vmul.f32 %v1100_v22, %v2573_v41  ;;  %v1209_v42 = vperm.slane %v1164_v39, 0  ;;  %v1629_v50 = vrot.slane %v2581_v44, 9 }
 0x345   : > { %v1171_v7 = vmul.f32 %v1170_v56, %v1152_v55  ;;  %v1123_v32 = vadd.f32 %v1115_v23, %v2576_v8  ;;  %v1117_v43 = vmul.f32 %v1101_v29, %v2581_v44  ;;  %v1212_v48 = vperm.slane %v1170_v56, 0 }
 0x346   : > { %v1634_v34 = vrot.slane %v1122_v24, 9  ;;  %v1124_v45 = vadd.f32 %v1116_v31, %v2590_v58  ;;  %v1156_v53 = vmul.f32 %v1628_v35, %v2573_v41  ;;  %v1230_v60 = vsel %vm1229_vm5, %v2556_v27, %v1209_v42 }
 0x347   : > { %v1176_v16 = vadd.f32 %v1632_v9, %v1171_v7  ;;  %v1635_v47 = vrot.slane %v1123_v32, 9  ;;  %v1125_v39 = vadd.f32 %v1117_v43, %v2597_v12  ;;  %v1232_v9 = vsel %vm1231_vm6, %v1230_v60, %v1212_v48 }
 0x348   : > { %v1636_v6 = vrot.slane %v1124_v45, 9  ;;  %v1157_v11 = vmul.f32 %v1629_v50, %v2581_v44 }
 0x349   : > { %v1177_v21 = vmul.f32 %v1176_v16, %v1153_v17  ;;  %v1215_v49 = vperm.slane %v1176_v16, 0  ;;  %v1637_v18 = vrot.slane %v1125_v39, 9 }
 0x34b   : > { %v1182_v25 = vadd.f32 %v1633_v19, %v1177_v21  ;;  %v1234_v10 = vsel %vm1233_vm7, %v1232_v9, %v1215_v49 }
 0x34d   : > { %v1183_v33 = vmul.f32 %v1182_v25, %v1154_v28  ;;  %v1218_v0 = vperm.slane %v1182_v25, 0 }
 0x34f   : > { %v1188_v38 = vadd.f32 %v1634_v34, %v1183_v33  ;;  %v1236_v16 = vsel %vm1235_vm8, %v1234_v10, %v1218_v0 }
 0x351   : > { %v1189_v46 = vmul.f32 %v1188_v38, %v1155_v37  ;;  %v1221_v7 = vperm.slane %v1188_v38, 0 }
 0x353   : > { %v1194_v55 = vadd.f32 %v1635_v47, %v1189_v46  ;;  %v1238_v19 = vsel %vm1237_vm9, %v1236_v16, %v1221_v7 }
 0x355   : > { %v1195_v5 = vmul.f32 %v1194_v55, %v1156_v53  ;;  %v1224_v56 = vperm.slane %v1194_v55, 0 }
 0x357   : > { %v1200_v13 = vadd.f32 %v1636_v6, %v1195_v5  ;;  %v1240_v20 = vsel %vm1239_vm10, %v1238_v19, %v1224_v56 }
 0x359   : > { %v1201_v17 = vmul.f32 %v1200_v13, %v1157_v11  ;;  %v1227_v27 = vperm.slane %v1200_v13, 0  ;;  %v966_v13 = vpop.f32.mrf.mxu3 }
 0x35b   : > { %v1206_v21 = vadd.f32 %v1637_v18, %v1201_v17  ;;  %v1242_v22 = vsel %vm1241_vm11, %v1240_v20, %v1227_v27 }
 0x35c   : > { %v1245_v23 = vrot.slane %v1242_v22, 4  ;;  %v1246_v24 = vrot.slane %v1242_v22, 6  ;;  %v1244_v25 = vrot.slane %v1242_v22, 2  ;;  %v1247_v26 = vrot.slane %v1242_v22, 1 }
 0x35d   : > { %1207 = vst [vmem:[#allocation2] sm:$0x1] %v1206_v21  ;;  %v1259_v28 = vmul.f32 %v2524_v59, %v1242_v22 }
 0x35e   : > { %v1249_v29 = vrot.slane %v1245_v23, 1  ;;  %v1250_v31 = vrot.slane %v1246_v24, 1  ;;  %v1263_v32 = vmul.f32 %v2565_v36, %v1245_v23  ;;  %v1265_v33 = vmul.f32 %v1246_v24, %v2573_v41  ;;  %v1386_v24 = vld [vmem:[%s2789_s14 + $0x10] sm:$0xff] }
 0x35f   : > { %v1248_v34 = vrot.slane %v1244_v25, 1  ;;  %v1260_v35 = vmul.f32 %v1247_v26, %v2527_v61  ;;  %v1261_v37 = vmul.f32 %v1244_v25, %v2530_v62  ;;  %v1267_v38 = vadd.f32 %v1259_v28, %v2522_v57 }
 0x360   : > { %v1264_v42 = vmul.f32 %v1249_v29, %v2570_v40  ;;  %v1266_v43 = vmul.f32 %v1250_v31, %v2581_v44  ;;  %v1271_v45 = vadd.f32 %v1263_v32, %v2560_v30  ;;  %v1273_v46 = vadd.f32 %v1265_v33, %v2590_v58 }
 0x361   : > { %v1262_v47 = vmul.f32 %v1248_v34, %v2533_v63  ;;  %v1268_v48 = vadd.f32 %v1260_v35, %v2537_v2  ;;  %v1269_v49 = vadd.f32 %v1261_v37, %v2540_v4  ;;  %v1283_v50 = vrot.slane %v1267_v38, 7 }
 0x362   : > { %v1272_v53 = vadd.f32 %v1264_v42, %v2576_v8  ;;  %v1274_v55 = vadd.f32 %v1266_v43, %v2597_v12  ;;  %v1287_v60 = vrot.slane %v1271_v45, 7  ;;  %v1289_v0 = vrot.slane %v1273_v46, 7  ;;  %v1384_v42 = vld [vmem:[%s2789_s14] sm:$0xff] }
 0x363   : > { %v1270_v39 = vadd.f32 %v1262_v47, %v2548_v15  ;;  %v1284_v5 = vrot.slane %v1268_v48, 7  ;;  %v1285_v6 = vrot.slane %v1269_v49, 7  ;;  %v1299_v7 = vmul.f32 %v2524_v59, %v1283_v50  ;;  %v1796_v43 = vld [vmem:[%s2790_s3] ss:$0 sm:$0xff]  ;;  %v1377_v47 = vpop.permute.xlu0 %1376 }
 0x364   : > { %v1288_v9 = vrot.slane %v1272_v53, 7  ;;  %v1290_v56 = vrot.slane %v1274_v55, 7  ;;  %v1303_v10 = vmul.f32 %v2565_v36, %v1287_v60  ;;  %v1305_v11 = vmul.f32 %v1289_v0, %v2573_v41 }
 0x365   : > { %v1286_v16 = vrot.slane %v1270_v39, 7  ;;  %v1300_v17 = vmul.f32 %v1284_v5, %v2527_v61  ;;  %v1301_v18 = vmul.f32 %v1285_v6, %v2530_v62  ;;  %v1307_v27 = vadd.f32 %v1299_v7, %v2522_v57 }
 0x366   : > { %v1304_v19 = vmul.f32 %v1288_v9, %v2570_v40  ;;  %v1306_v20 = vmul.f32 %v1290_v56, %v2581_v44  ;;  %v1311_v59 = vadd.f32 %v1303_v10, %v2560_v30  ;;  %v1313_v21 = vadd.f32 %v1305_v11, %v2590_v58 }
 0x367   : > { %v1302_v36 = vmul.f32 %v1286_v16, %v2533_v63  ;;  %v1308_v41 = vadd.f32 %v1300_v17, %v2537_v2  ;;  %v1309_v22 = vadd.f32 %v1301_v18, %v2540_v4  ;;  %v1315_v61 = vsel %vm1229_vm5, %v1267_v38, %v1307_v27  ;;  %v1385_v38 = vld [vmem:[%s2789_s14 + $0x8] sm:$0xff] }
 0x368   : > { %v1312_v62 = vadd.f32 %v1304_v19, %v2576_v8  ;;  %v1314_v57 = vadd.f32 %v1306_v20, %v2597_v12  ;;  %v1319_v40 = vsel %vm1229_vm5, %v1271_v45, %v1311_v59  ;;  %v1321_v44 = vsel %vm1229_vm5, %v1273_v46, %v1313_v21  ;;  %1331 = vst [vmem:[#allocation1] ss:$4 sm:$0xff] %v1315_v61  ;;  %v969_v12 = vpop.f32.mrf.mxu3 }
 0x369   : > { %1339 = vst [vmem:[#allocation1 + $0x20] ss:$4 sm:$0xff] %v1319_v40  ;;  %v1310_v30 = vadd.f32 %v1302_v36, %v2548_v15  ;;  %v1316_v4 = vsel %vm1229_vm5, %v1268_v48, %v1308_v41  ;;  %v1317_v8 = vsel %vm1229_vm5, %v1269_v49, %v1309_v22  ;;  %v892_v23 = vperm.slane %v2507_v54, 2  ;;  %v1387_v15 = vld [vmem:[%s2789_s14 + $0x18] sm:$0xff] }
 0x36a   : > { %v1320_v63 = vsel %vm1229_vm5, %v1272_v53, %v1312_v62  ;;  %v1322_v2 = vsel %vm1229_vm5, %v1274_v55, %v1314_v57  ;;  %1343 = vst [vmem:[#allocation1 + $0x22] ss:$4 sm:$0xff] %v1321_v44  ;;  %1410 = vmatpush.msrb.mxu0 %v1387_v15  ;;  %v1365_v54 = vmul.f32 0.5, %v2475_v14  ;;  %v1360_v45 = vmul.f32 %v1796_v43, %v2488_v52  ;;  %v1797_v52 = vld [vmem:[%s2791_s17] ss:$0 sm:$0xff] }
 0x36b   : > { %1341 = vst [vmem:[#allocation1 + $0x21] ss:$4 sm:$0xff] %v1320_v63  ;;  %v1318_v58 = vsel %vm1229_vm5, %v1270_v39, %v1310_v30  ;;  %v970_v25 = vadd.f32 %v969_v12, %v892_v23  ;;  %v967_v29 = vadd.f32 %v966_v13, %v892_v23  ;;  %v1361_v50 = vmul.f32 %v1796_v43, %v2486_v51 }
 0x36c   : > { %1345 = vst [vmem:[#allocation1 + $0x23] ss:$4 sm:$0xff] %v1322_v2  ;;  %1411 = vmatpush.msrb.mxu0 %v1386_v24  ;;  %1826 = vtanh.f32 %v1365_v54 }
 0x36d   : > { %1333 = vst [vmem:[#allocation1 + $0x1] ss:$4 sm:$0xff] %v1316_v4 }
 0x36e   : > { %1335 = vst [vmem:[#allocation1 + $0x2] ss:$4 sm:$0xff] %v1317_v8  ;;  %1412 = vmatpush.msrb.mxu0 %v1385_v38 }
 0x36f   : > { %1337 = vst [vmem:[#allocation1 + $0x3] ss:$4 sm:$0xff] %v1318_v58 }
 0x370   : > { %1413 = vmatpush.msrb.mxu0 %v1384_v42 }
 0x372   : > { %v1827_v33 = vpop.eup %1826 }
 0x373   : > { %v1347_v26 = vld.sshfl [vmem:[#allocation1 + $0x20] sm:$0xff pattern:$0x73625140]  ;;  %v1369_v34 = vmul.f32 0.5, %v1827_v33 }
 0x374   : > { %v1351_v28 = vmul.f32 %v1347_v26, %v970_v25 }
 0x375   : > { %v1371_v35 = vadd.f32 0.5, %v1369_v34 }
 0x376   : > { %1354 = vadd.xlane.f32.xlu1 %v1351_v28  ;;  %v1346_v31 = vld.sshfl [vmem:[#allocation1] sm:$0xff pattern:$0x73625140] }
 0x377   : > { %v1350_v32 = vmul.f32 %v1346_v31, %v967_v29  ;;  %v1373_v37 = vmul.f32 %v1371_v35, %v2475_v14 }
 0x379   : > { %1352 = vadd.xlane.f32.xlu2 %v1350_v32 }
 0x391   : > { %1378 = vrot.lane.b32.xlu2 %v1373_v37, %s2122_s7 }
 0x3e9   : > { %v1355_v49 = vpop.xlane.xlu1 %1354 }
 0x3ea   : > { %v1363_v55 = vadd.f32 %v1361_v50, %v1355_v49 }
 0x3ec   : > { %v1353_v14 = vpop.xlane.xlu2 %1352 }
 0x3ed   : > { %v1362_v46 = vadd.f32 %v1360_v45, %v1353_v14 }
 0x3ef   : > { %v1382_v48 = vmul.f32 %v1377_v47, %v1362_v46 }
 0x3f1   : > { %1638 = vmatmul.msk.f32.vlgmr.msrb.gmra.mxu0 %vm896_vm14, %v1382_v48 }
 0x3f4   : > { %v1379_v53 = vpop.permute.xlu2 %1378 }
 0x3f5   : > { %v1383_v60 = vmul.f32 %v1379_v53, %v1363_v55 }
 0x3f9   : > { %1639 = vmatmul.msk.f32.gmra.mxu0 %vm896_vm14, %v1383_v60 }
 0x46e   : > { %v1415_v0 = vpop.f32.mrf.mxu0 }
 0x46f   : > { %v1416_v39 = vadd.f32 %v1797_v52, %v1415_v0 }
 0x471   : > { %v1421_v5 = vadd.f32 %v1416_v39, %v2414_v1 }
 0x473   : > { %1423 = vst.msk [vmem:[%s2411_s18] sm:$0xff] %vm704_vm1, %v1421_v5 }
 0x476   : > { %v1418_v6 = vpop.f32.mrf.mxu0 }
 0x477   : > { %v1419_v7 = vadd.f32 %v1797_v52, %v1418_v6 }
 0x479   : > { %v1422_v9 = vadd.f32 %v1419_v7, %v2418_v3 }
 0x47b   : > { %1424 = vst.msk [vmem:[%s2411_s18 + $0x8] sm:$0xff] %vm704_vm1, %v1422_v9 }
 0x47c PF: > { %s34_s0 = sadd.s32 1, %s2114_s0   ;;  %s2792_s10 = sld [smem:[#allocation21_spill]] }
 0x47d   : > { %p31_p11 = scmp.ge.s32.totalorder %s34_s0, 6   ;;  %s2793_s21 = smov %s2078_s22 }
 0x47e   : > { %s2794_s22 = smov %s2082_s23  ;;  %s2795_s23 = smov %s2366_s5 }
 0x47f   : > { %s2796_s24 = smov %s2090_s25  ;;  %s2797_s25 = smov %s2094_s26 }
 0x480   : > { %s2798_s26 = smov %s2363_s15  ;;  %s2799_s27 = smov %s2106_s29 }
 0x481   : > { %s2800_s28 = smov %s2110_s30  ;;  %s2802_s30 = smov %s2808_s9 }
 0x482   : > { %s2801_s29 = smov %s2792_s10  ;;  %33 = sbr.rel (!%p31_p11) target bundleno = 28 (0x1c), region = 167 }
 0x487   :  { %1455 = vsyncpa [#allocation5], 1 }
 0x488   :  { %1457 = vsyncpa [#allocation5 + $0x1], 1 }
 0x489   :  { %1458 = vsyncpa [#allocation7], 1 }
 0x48a   :  { %1460 = vsyncpa [#allocation7 + $0x1], 1 }
 0x48b   :  { %1461 = vsyncpa [#allocation10], 1 }
 0x48c   :  { %1462 = vsyncpa [#allocation13], 1 }

</bundles_post_ra>
